<compile_context>
chip_gen: v7x
topology: tpu7x:2x2x1
jax: 0.10.0
libtpu: 0.0.40
codegen_flags: <defaults>
</compile_context>

<pallas_src>
import functools

import jax
import jax.numpy as jnp
from jax.experimental import pallas as pl
from jax.experimental.pallas import tpu as pltpu

_MIB = 1024 * 1024


# ---------------------------------------------------------------------------
# Kernels
# ---------------------------------------------------------------------------

def _fused_merge_kernel(xe_ref, xo_ref, we_ref, wo_ref, b_ref, o_ref, *, eps):
    """Fused even/odd gather + LayerNorm(4C) + Linear(4C->2C), one row tile.

    xe_ref, xo_ref : (tr, W/2, 2C)   even-h / odd-h source rows; the trailing
                     2C lanes hold the (even-w | odd-w) channel pair of one
                     merged patch, i.e. channels [x0|x2] resp. [x1|x3].
    we_ref, wo_ref : (2C, 2C)        gamma-folded, channel-permuted halves of W^T.
    b_ref          : (1, 2C)         beta @ W^T (f32).
    o_ref          : (tr*W/2, 2C)    output rows (merged patches, row-major).
    """
    tr, wh, c2 = xe_ref.shape
    m = tr * wh
    inv_c4 = 1.0 / (2.0 * c2)

    # Cast to f32 first, then collapse (tr, wh) -> rows.  With wh % 8 == 0 the
    # collapse is layout-preserving for the (8,128)-tiled f32 value (no copy).
    xe = xe_ref[...].astype(jnp.float32).reshape(m, c2)
    xo = xo_ref[...].astype(jnp.float32).reshape(m, c2)

    # LayerNorm statistics over the full 4C (= both halves), biased variance.
    mean = (jnp.sum(xe, axis=-1, keepdims=True)
            + jnp.sum(xo, axis=-1, keepdims=True)) * inv_c4
    ce = xe - mean
    co = xo - mean
    var = (jnp.sum(ce * ce, axis=-1, keepdims=True)
           + jnp.sum(co * co, axis=-1, keepdims=True)) * inv_c4
    scale = jax.lax.rsqrt(var + eps)                    # EUP slot, per row

    ye = (ce * scale).astype(we_ref.dtype)              # gamma/beta folded into W
    yo = (co * scale).astype(wo_ref.dtype)

    out = (jnp.dot(ye, we_ref[...], preferred_element_type=jnp.float32)
           + jnp.dot(yo, wo_ref[...], preferred_element_type=jnp.float32)
           + b_ref[...].astype(jnp.float32))
    o_ref[...] = out.astype(o_ref.dtype)


def _slab_merge_kernel(x_ref, w_ref, b_ref, o_ref, *, eps):
    """Fallback: LayerNorm(4C) + Linear on a pre-gathered (tile_n, 4C) slab."""
    x = x_ref[...].astype(jnp.float32)
    mean = jnp.mean(x, axis=-1, keepdims=True)
    cen = x - mean
    var = jnp.mean(cen * cen, axis=-1, keepdims=True)
    xn = (cen * jax.lax.rsqrt(var + eps)).astype(w_ref.dtype)
    out = (jnp.dot(xn, w_ref[...], preferred_element_type=jnp.float32)
           + b_ref[...].astype(jnp.float32))
    o_ref[...] = out.astype(o_ref.dtype)


# ---------------------------------------------------------------------------
# Parameter folding & tiling helpers
# ---------------------------------------------------------------------------

def _fold_params(gamma, beta, w, matmul_dtype):
    """Fold the LayerNorm affine into the bias-free reduction weight.

        LN(x) @ W^T == xhat @ (gamma[:, None] * W^T) + (beta @ W^T)
    """
    w_t = jnp.transpose(w).astype(jnp.float32)                 # (4C, 2C)
    w_eff = gamma.astype(jnp.float32)[:, None] * w_t           # (4C, 2C)
    b_eff = beta.astype(jnp.float32)[None, :] @ w_t            # (1, 2C), keep f32
    return w_eff.astype(matmul_dtype), b_eff


def _divisors_desc(n):
    ds = set()
    i = 1
    while i * i <= n:
        if n % i == 0:
            ds.add(i)
            ds.add(n // i)
        i += 1
    return sorted(ds, reverse=True)


# ---------------------------------------------------------------------------
# Fused path (no HBM intermediate)
# ---------------------------------------------------------------------------

def _fused_forward(x, w_eff, b_eff, input_resolution, eps, out_dtype,
                   buffer_invariant):
    H, W = input_resolution
    B, L, C = x.shape
    Wh = W // 2
    R = B * (H // 2)
    N = R * Wh
    C2, C4 = 2 * C, 4 * C

    # Free metadata reshape: (B, H*W, C) -> (B*H/2, 2, W/2, 2C).
    # Last dim per merged patch = [even-w channels | odd-w channels].
    x4 = x.reshape(R, 2, Wh, C2)

    # Channel-permuted weight halves matching the kernel's [x0|x2] / [x1|x3]
    # channel order (reference/torch order is [x0|x1|x2|x3]).
    we = jnp.concatenate([w_eff[0:C], w_eff[2 * C:3 * C]], axis=0)   # (2C, 2C)
    wo = jnp.concatenate([w_eff[C:2 * C], w_eff[3 * C:4 * C]], axis=0)

    in_bytes = x.dtype.itemsize
    out_bytes = jnp.dtype(out_dtype).itemsize
    w_bytes = we.dtype.itemsize

    budget = 32 * _MIB          # per-step block + working-set budget
    target_rows = 1024          # ~85% of HBM roofline at 512-1024 rows (v6e)

    w_bufs = 1 if buffer_invariant else 2

    def footprint(tr):
        m = tr * Wh
        io = 2 * (2 * m * C2 * in_bytes)        # xe + xo, double-buffered
        io += 2 * (m * C2 * out_bytes)          # out, double-buffered
        wts = w_bufs * (2 * C2 * C2 * w_bytes + C2 * 4)
        work = 6 * m * C2 * 4                   # f32 temporaries / spill headroom
        return io + wts + work

    tr = None
    for cand in _divisors_desc(R):
        if cand * Wh > target_rows:
            continue
        if R >= 2 and R // cand < 2:            # keep >= 2 grid steps (v7x megacore)
            continue
        if footprint(cand) > budget:
            continue
        tr = cand
        break
    if tr is None:
        tr = 1
        if footprint(tr) > budget:
            return None                         # too big even per h-row pair -> slab

    m_rows = tr * Wh
    grid = (R // tr,)
    # Explicit scoped-VMEM request: above v5e's 16 MiB default, but capped at
    # 48 MiB so the same kernel leaves headroom inside v7x's 64 MiB physical.
    vmem_limit = int(min(48 * _MIB, max(32 * _MIB, int(footprint(tr) * 1.5))))

    cost = pl.CostEstimate(
        flops=2 * N * C4 * C2,
        transcendentals=N,
        bytes_accessed=(N * C4 * in_bytes + N * C2 * out_bytes
                        + 2 * C2 * C2 * w_bytes + C2 * 4),
    )

    inv_kwargs = {}
    if buffer_invariant:
        # Grid-invariant operands: single-buffer to halve their VMEM footprint.
        inv_kwargs = dict(pipeline_mode=pl.Buffered(1))

    grid_spec = pltpu.PrefetchScalarGridSpec(
        num_scalar_prefetch=0,
        grid=grid,
        in_specs=[
            pl.BlockSpec((tr, None, Wh, C2), lambda i: (i, 0, 0, 0)),  # even-h rows
            pl.BlockSpec((tr, None, Wh, C2), lambda i: (i, 1, 0, 0)),  # odd-h rows
            pl.BlockSpec((C2, C2), lambda i: (0, 0), **inv_kwargs),
            pl.BlockSpec((C2, C2), lambda i: (0, 0), **inv_kwargs),
            pl.BlockSpec((1, C2), lambda i: (0, 0), **inv_kwargs),
        ],
        out_specs=pl.BlockSpec((m_rows, C2), lambda i: (i, 0)),
    )

    out_flat = pl.pallas_call(
        functools.partial(_fused_merge_kernel, eps=eps),
        out_shape=jax.ShapeDtypeStruct((N, C2), out_dtype),
        grid_spec=grid_spec,
        compiler_params=pltpu.CompilerParams(
            dimension_semantics=("parallel",),
            vmem_limit_bytes=vmem_limit),
        cost_estimate=cost,
    )(x4, x4, we, wo, b_eff)

    return out_flat.reshape(B, (H // 2) * Wh, C2)


# ---------------------------------------------------------------------------
# Slab fallback path (pre-gathered (N, 4C) intermediate; always lowers)
# ---------------------------------------------------------------------------

def _slab_forward(x, w_eff, b_eff, input_resolution, eps, out_dtype):
    H, W = input_resolution
    B, L, C = x.shape
    C2, C4 = 2 * C, 4 * C

    xg = x.reshape(B, H // 2, 2, W // 2, 2, C)
    x0 = xg[:, :, 0, :, 0, :]
    x1 = xg[:, :, 1, :, 0, :]
    x2 = xg[:, :, 0, :, 1, :]
    x3 = xg[:, :, 1, :, 1, :]
    xf = jnp.concatenate([x0, x1, x2, x3], axis=-1).reshape(-1, C4)
    N = xf.shape[0]

    in_bytes = x.dtype.itemsize
    out_bytes = jnp.dtype(out_dtype).itemsize
    w_bytes = w_eff.dtype.itemsize
    budget = 32 * _MIB

    def footprint(tn):
        return (2 * tn * C4 * in_bytes + 2 * tn * C2 * out_bytes
                + 2 * C4 * C2 * w_bytes + C2 * 4 + 4 * tn * C4 * 4)

    tile_n = N
    for cand in (1024, 512, 256, 128, 64, 32, 16, 8):
        if N % cand == 0 and footprint(cand) <= budget:
            tile_n = cand
            break
    # NOTE: if N has no aligned divisor, tile_n == N (single grid step) — correct
    # but unpipelined; the fused path covers all aligned/real Swin shapes.

    vmem_limit = int(min(48 * _MIB, max(32 * _MIB, int(footprint(tile_n) * 1.5))))

    cost = pl.CostEstimate(
        flops=2 * N * C4 * C2,
        transcendentals=N,
        bytes_accessed=(N * C4 * in_bytes + N * C2 * out_bytes
                        + C4 * C2 * w_bytes + C2 * 4),
    )

    out_flat = pl.pallas_call(
        functools.partial(_slab_merge_kernel, eps=eps),
        out_shape=jax.ShapeDtypeStruct((N, C2), out_dtype),
        grid_spec=pltpu.PrefetchScalarGridSpec(
            num_scalar_prefetch=0,
            grid=(N // tile_n,),
            in_specs=[
                pl.BlockSpec((tile_n, C4), lambda i: (i, 0)),
                pl.BlockSpec((C4, C2), lambda i: (0, 0)),
                pl.BlockSpec((1, C2), lambda i: (0, 0)),
            ],
            out_specs=pl.BlockSpec((tile_n, C2), lambda i: (i, 0)),
        ),
        compiler_params=pltpu.CompilerParams(
            dimension_semantics=("parallel",),
            vmem_limit_bytes=vmem_limit),
        cost_estimate=cost,
    )(xf, w_eff, b_eff)

    return out_flat.reshape(B, (H // 2) * (W // 2), C2)


# ---------------------------------------------------------------------------
# Public entry point
# ---------------------------------------------------------------------------

def patch_merging_forward(x, gamma, beta, w, input_resolution, *, eps=1e-5,
                          matmul_dtype=jnp.bfloat16):
    """x: (B, H*W, C).  gamma/beta: (4C,).  w: (2C, 4C) (torch Linear weight).

    Returns (B, H*W/4, 2C), matching PatchMerging.forward.
    """
    H, W = input_resolution
    B, L, C = x.shape
    assert L == H * W, f"input feature has wrong size: {L} != {H * W}"
    assert H % 2 == 0 and W % 2 == 0, f"x size ({H}*{W}) are not even."

    w_eff, b_eff = _fold_params(gamma, beta, w, matmul_dtype)
    out_dtype = x.dtype

    # Fast fused path: requires W/2 % 8 == 0 so the in-kernel (tr, W/2, 2C) ->
    # (tr*W/2, 2C) collapse is sublane-tile aligned (true for all real Swin
    # resolutions).  On any lowering hiccup (e.g. pipeline_mode=Buffered(1)
    # unsupported on an older JAX build) retry without single-buffering, then
    # fall back to the previously validated slab path.
    if (W // 2) % 8 == 0:
        for buffered in (True, False):
            try:
                res = _fused_forward(x, w_eff, b_eff, (H, W), eps, out_dtype,
                                     buffer_invariant=buffered)
            except Exception:
                res = None
            if res is not None:
                return res
    return _slab_forward(x, w_eff, b_eff, (H, W), eps, out_dtype)


# ---------------------------------------------------------------------------
# Pure-JAX reference (mirrors the PyTorch module) and self-test
# ---------------------------------------------------------------------------

def _reference_forward(x, gamma, beta, w, input_resolution, eps=1e-5):
    H, W = input_resolution
    B, L, C = x.shape
    xg = x.reshape(B, H, W, C)
    x0 = xg[:, 0::2, 0::2, :]
    x1 = xg[:, 1::2, 0::2, :]
    x2 = xg[:, 0::2, 1::2, :]
    x3 = xg[:, 1::2, 1::2, :]
    xc = jnp.concatenate([x0, x1, x2, x3], axis=-1).reshape(B, -1, 4 * C)
    mean = jnp.mean(xc, axis=-1, keepdims=True)
    var = jnp.mean((xc - mean) ** 2, axis=-1, keepdims=True)
    xn = (xc - mean) / jnp.sqrt(var + eps)
    y = xn * gamma + beta
    return jnp.einsum("bld,od->blo", y, w)


if __name__ == "__main__":
    # Small shapes consistent with the module: B=2, dim C=4, H=W=16 -> x (2, 256, 4)
    B, C = 2, 4
    H, W = 16, 16
    key = jax.random.PRNGKey(0)
    kx, kw, kg, kb = jax.random.split(key, 4)

    x = jax.random.normal(kx, (B, H * W, C), dtype=jnp.float32)
    # PatchMerging.__init__ shapes:
    #   reduction: Linear(4*dim, 2*dim, bias=False) -> weight (2C, 4C)
    #   norm:      LayerNorm(4*dim)                 -> gamma/beta (4C,)
    w = jax.random.normal(kw, (2 * C, 4 * C), dtype=jnp.float32) * 0.1
    gamma = 1.0 + 0.05 * jax.random.normal(kg, (4 * C,), dtype=jnp.float32)
    beta = 0.05 * jax.random.normal(kb, (4 * C,), dtype=jnp.float32)

    ref = _reference_forward(x, gamma, beta, w, (H, W))

    # 1) f32 matmul: tight check of the fused gather / LN / folded-weight math.
    out_f32 = patch_merging_forward(x, gamma, beta, w, (H, W),
                                    matmul_dtype=jnp.float32)
    out_f32 = jax.block_until_ready(out_f32)
    assert out_f32.shape == (B, (H * W) // 4, 2 * C), out_f32.shape
    assert jnp.allclose(out_f32, ref, atol=1e-4, rtol=1e-4), "f32 mismatch vs reference"

    # 2) Default config (bf16 MXU matmul, f32 accumulation): looser tolerance.
    out = patch_merging_forward(x, gamma, beta, w, (H, W))
    out = jax.block_until_ready(out)
    assert out.shape == (B, (H * W) // 4, 2 * C), out.shape
    assert jnp.allclose(out, ref, atol=2e-2, rtol=2e-2), "bf16 mismatch vs reference"

    print("KERNEL_OK")
</pallas_src>

<mosaic_0001>
module attributes {stable_mosaic.version = 11 : i64} {
  func.func @_fused_merge_kernel(%arg0: i32, %arg1: memref<8x1x8x8xf32, #tpu.memory_space<vmem>>, %arg2: memref<8x1x8x8xf32, #tpu.memory_space<vmem>>, %arg3: memref<8x8xf32, #tpu.memory_space<vmem>>, %arg4: memref<8x8xf32, #tpu.memory_space<vmem>>, %arg5: memref<1x8xf32, #tpu.memory_space<vmem>>, %arg6: memref<64x8xf32, #tpu.memory_space<vmem>>) attributes {dimension_semantics = [#tpu.dimension_semantics<parallel>], iteration_bounds = array<i64: 2>, scalar_prefetch = 0 : i64, scratch_operands = 0 : i64, tpu.core_type = #tpu.core_type<tc>, window_params = [{transform_indices = @transform_0, window_bounds = array<i64: 8, 1, 8, 8>}, {transform_indices = @transform_1, window_bounds = array<i64: 8, 1, 8, 8>}, {pipeline_mode = #tpu.pipeline_mode<synchronous>, transform_indices = @transform_2, window_bounds = array<i64: 8, 8>}, {pipeline_mode = #tpu.pipeline_mode<synchronous>, transform_indices = @transform_3, window_bounds = array<i64: 8, 8>}, {pipeline_mode = #tpu.pipeline_mode<synchronous>, transform_indices = @transform_4, window_bounds = array<i64: 1, 8>}, {transform_indices = @transform_5, window_bounds = array<i64: 64, 8>}]} {
    %c0 = arith.constant 0 : index
    %c0_0 = arith.constant 0 : index
    %c0_1 = arith.constant 0 : index
    %c0_2 = arith.constant 0 : index
    %0 = vector.load %arg1[%c0, %c0_0, %c0_1, %c0_2] : memref<8x1x8x8xf32, #tpu.memory_space<vmem>>, vector<8x1x8x8xf32>
    %1 = vector.shape_cast %0 : vector<8x1x8x8xf32> to vector<8x8x8xf32>
    %2 = vector.shape_cast %1 : vector<8x8x8xf32> to vector<64x8xf32>
    %c0_3 = arith.constant 0 : index
    %c0_4 = arith.constant 0 : index
    %c0_5 = arith.constant 0 : index
    %c0_6 = arith.constant 0 : index
    %3 = vector.load %arg2[%c0_3, %c0_4, %c0_5, %c0_6] : memref<8x1x8x8xf32, #tpu.memory_space<vmem>>, vector<8x1x8x8xf32>
    %4 = vector.shape_cast %3 : vector<8x1x8x8xf32> to vector<8x8x8xf32>
    %5 = vector.shape_cast %4 : vector<8x8x8xf32> to vector<64x8xf32>
    %cst = arith.constant dense<0.000000e+00> : vector<64xf32>
    %6 = vector.multi_reduction <add>, %2, %cst [1] : vector<64x8xf32> to vector<64xf32>
    %7 = vector.shape_cast %6 : vector<64xf32> to vector<64x1xf32>
    %cst_7 = arith.constant dense<0.000000e+00> : vector<64xf32>
    %8 = vector.multi_reduction <add>, %5, %cst_7 [1] : vector<64x8xf32> to vector<64xf32>
    %9 = vector.shape_cast %8 : vector<64xf32> to vector<64x1xf32>
    %10 = arith.addf %7, %9 : vector<64x1xf32>
    %cst_8 = arith.constant 6.250000e-02 : f32
    %11 = vector.broadcast %cst_8 : f32 to vector<64x1xf32>
    %12 = arith.mulf %10, %11 : vector<64x1xf32>
    %13 = vector.broadcast %12 : vector<64x1xf32> to vector<64x8xf32>
    %14 = arith.subf %2, %13 : vector<64x8xf32>
    %15 = vector.broadcast %12 : vector<64x1xf32> to vector<64x8xf32>
    %16 = arith.subf %5, %15 : vector<64x8xf32>
    %17 = arith.mulf %14, %14 : vector<64x8xf32>
    %cst_9 = arith.constant dense<0.000000e+00> : vector<64xf32>
    %18 = vector.multi_reduction <add>, %17, %cst_9 [1] : vector<64x8xf32> to vector<64xf32>
    %19 = vector.shape_cast %18 : vector<64xf32> to vector<64x1xf32>
    %20 = arith.mulf %16, %16 : vector<64x8xf32>
    %cst_10 = arith.constant dense<0.000000e+00> : vector<64xf32>
    %21 = vector.multi_reduction <add>, %20, %cst_10 [1] : vector<64x8xf32> to vector<64xf32>
    %22 = vector.shape_cast %21 : vector<64xf32> to vector<64x1xf32>
    %23 = arith.addf %19, %22 : vector<64x1xf32>
    %cst_11 = arith.constant 6.250000e-02 : f32
    %24 = vector.broadcast %cst_11 : f32 to vector<64x1xf32>
    %25 = arith.mulf %23, %24 : vector<64x1xf32>
    %cst_12 = arith.constant 9.99999974E-6 : f32
    %26 = vector.broadcast %cst_12 : f32 to vector<64x1xf32>
    %27 = arith.addf %25, %26 : vector<64x1xf32>
    %28 = math.rsqrt %27 : vector<64x1xf32>
    %29 = vector.broadcast %28 : vector<64x1xf32> to vector<64x8xf32>
    %30 = arith.mulf %14, %29 : vector<64x8xf32>
    %31 = vector.broadcast %28 : vector<64x1xf32> to vector<64x8xf32>
    %32 = arith.mulf %16, %31 : vector<64x8xf32>
    %c0_13 = arith.constant 0 : index
    %c0_14 = arith.constant 0 : index
    %33 = vector.load %arg3[%c0_13, %c0_14] : memref<8x8xf32, #tpu.memory_space<vmem>>, vector<8x8xf32>
    %cst_15 = arith.constant dense<0.000000e+00> : vector<64x8xf32>
    %34 = tpu.matmul %30, %33, %cst_15 {dimension_numbers = #tpu.dot_dimension_numbers<[1], [0], [0], [1], [0, 0, 1, 1], [], []>} : vector<64x8xf32>, vector<8x8xf32>, vector<64x8xf32> -> vector<64x8xf32>
    %c0_16 = arith.constant 0 : index
    %c0_17 = arith.constant 0 : index
    %35 = vector.load %arg4[%c0_16, %c0_17] : memref<8x8xf32, #tpu.memory_space<vmem>>, vector<8x8xf32>
    %cst_18 = arith.constant dense<0.000000e+00> : vector<64x8xf32>
    %36 = tpu.matmul %32, %35, %cst_18 {dimension_numbers = #tpu.dot_dimension_numbers<[1], [0], [0], [1], [0, 0, 1, 1], [], []>} : vector<64x8xf32>, vector<8x8xf32>, vector<64x8xf32> -> vector<64x8xf32>
    %37 = arith.addf %34, %36 : vector<64x8xf32>
    %c0_19 = arith.constant 0 : index
    %c0_20 = arith.constant 0 : index
    %38 = vector.load %arg5[%c0_19, %c0_20] : memref<1x8xf32, #tpu.memory_space<vmem>>, vector<1x8xf32>
    %39 = vector.broadcast %38 : vector<1x8xf32> to vector<64x8xf32>
    %40 = arith.addf %37, %39 : vector<64x8xf32>
    %c0_21 = arith.constant 0 : index
    %c0_22 = arith.constant 0 : index
    %41 = vector.load %arg6[%c0_21, %c0_22] : memref<64x8xf32, #tpu.memory_space<vmem>>, vector<64x8xf32>
    tpu.vector_store %arg6[%c0_21, %c0_22], %40 {strides = array<i32>} : memref<64x8xf32, #tpu.memory_space<vmem>>, vector<64x8xf32>,
    return
  }
  func.func @transform_0(%arg0: i32) -> (i32, i32, i32, i32) {
    %c0_i32 = arith.constant 0 : i32
    %c0_i32_0 = arith.constant 0 : i32
    %c0_i32_1 = arith.constant 0 : i32
    %c0_i32_2 = arith.constant 0 : i32
    return %arg0, %c0_i32, %c0_i32_0, %c0_i32_1 : i32, i32, i32, i32
  }
  func.func @transform_1(%arg0: i32) -> (i32, i32, i32, i32) {
    %c1_i32 = arith.constant 1 : i32
    %c0_i32 = arith.constant 0 : i32
    %c0_i32_0 = arith.constant 0 : i32
    %c0_i32_1 = arith.constant 0 : i32
    return %arg0, %c1_i32, %c0_i32, %c0_i32_0 : i32, i32, i32, i32
  }
  func.func @transform_2(%arg0: i32) -> (i32, i32) {
    %c0_i32 = arith.constant 0 : i32
    %c0_i32_0 = arith.constant 0 : i32
    %c0_i32_1 = arith.constant 0 : i32
    return %c0_i32, %c0_i32_0 : i32, i32
  }
  func.func @transform_3(%arg0: i32) -> (i32, i32) {
    %c0_i32 = arith.constant 0 : i32
    %c0_i32_0 = arith.constant 0 : i32
    %c0_i32_1 = arith.constant 0 : i32
    return %c0_i32, %c0_i32_0 : i32, i32
  }
  func.func @transform_4(%arg0: i32) -> (i32, i32) {
    %c0_i32 = arith.constant 0 : i32
    %c0_i32_0 = arith.constant 0 : i32
    %c0_i32_1 = arith.constant 0 : i32
    return %c0_i32, %c0_i32_0 : i32, i32
  }
  func.func @transform_5(%arg0: i32) -> (i32, i32) {
    %c0_i32 = arith.constant 0 : i32
    %c0_i32_0 = arith.constant 0 : i32
    return %arg0, %c0_i32 : i32, i32
  }
}

module attributes {stable_mosaic.version = 11 : i64} {
  func.func @_fused_merge_kernel(%arg0: i32, %arg1: memref<8x1x8x8xf32, #tpu.memory_space<vmem>>, %arg2: memref<8x1x8x8xf32, #tpu.memory_space<vmem>>, %arg3: memref<8x8xf32, #tpu.memory_space<vmem>>, %arg4: memref<8x8xf32, #tpu.memory_space<vmem>>, %arg5: memref<1x8xf32, #tpu.memory_space<vmem>>, %arg6: memref<64x8xf32, #tpu.memory_space<vmem>>) attributes {dimension_semantics = [#tpu.dimension_semantics<parallel>], iteration_bounds = array<i64: 2>, scalar_prefetch = 0 : i64, scratch_operands = 0 : i64, tpu.core_type = #tpu.core_type<tc>, window_params = [{transform_indices = @transform_0, window_bounds = array<i64: 8, 1, 8, 8>}, {transform_indices = @transform_1, window_bounds = array<i64: 8, 1, 8, 8>}, {pipeline_mode = #tpu.pipeline_mode<synchronous>, transform_indices = @transform_2, window_bounds = array<i64: 8, 8>}, {pipeline_mode = #tpu.pipeline_mode<synchronous>, transform_indices = @transform_3, window_bounds = array<i64: 8, 8>}, {pipeline_mode = #tpu.pipeline_mode<synchronous>, transform_indices = @transform_4, window_bounds = array<i64: 1, 8>}, {transform_indices = @transform_5, window_bounds = array<i64: 64, 8>}]} {
    %c0 = arith.constant 0 : index
    %c0_0 = arith.constant 0 : index
    %c0_1 = arith.constant 0 : index
    %c0_2 = arith.constant 0 : index
    %0 = vector.load %arg1[%c0, %c0_0, %c0_1, %c0_2] : memref<8x1x8x8xf32, #tpu.memory_space<vmem>>, vector<8x1x8x8xf32>
    %1 = vector.shape_cast %0 : vector<8x1x8x8xf32> to vector<8x8x8xf32>
    %2 = vector.shape_cast %1 : vector<8x8x8xf32> to vector<64x8xf32>
    %c0_3 = arith.constant 0 : index
    %c0_4 = arith.constant 0 : index
    %c0_5 = arith.constant 0 : index
    %c0_6 = arith.constant 0 : index
    %3 = vector.load %arg2[%c0_3, %c0_4, %c0_5, %c0_6] : memref<8x1x8x8xf32, #tpu.memory_space<vmem>>, vector<8x1x8x8xf32>
    %4 = vector.shape_cast %3 : vector<8x1x8x8xf32> to vector<8x8x8xf32>
    %5 = vector.shape_cast %4 : vector<8x8x8xf32> to vector<64x8xf32>
    %cst = arith.constant dense<0.000000e+00> : vector<64xf32>
    %6 = vector.multi_reduction <add>, %2, %cst [1] : vector<64x8xf32> to vector<64xf32>
    %7 = vector.shape_cast %6 : vector<64xf32> to vector<64x1xf32>
    %cst_7 = arith.constant dense<0.000000e+00> : vector<64xf32>
    %8 = vector.multi_reduction <add>, %5, %cst_7 [1] : vector<64x8xf32> to vector<64xf32>
    %9 = vector.shape_cast %8 : vector<64xf32> to vector<64x1xf32>
    %10 = arith.addf %7, %9 : vector<64x1xf32>
    %cst_8 = arith.constant 6.250000e-02 : f32
    %11 = vector.broadcast %cst_8 : f32 to vector<64x1xf32>
    %12 = arith.mulf %10, %11 : vector<64x1xf32>
    %13 = vector.broadcast %12 : vector<64x1xf32> to vector<64x8xf32>
    %14 = arith.subf %2, %13 : vector<64x8xf32>
    %15 = vector.broadcast %12 : vector<64x1xf32> to vector<64x8xf32>
    %16 = arith.subf %5, %15 : vector<64x8xf32>
    %17 = arith.mulf %14, %14 : vector<64x8xf32>
    %cst_9 = arith.constant dense<0.000000e+00> : vector<64xf32>
    %18 = vector.multi_reduction <add>, %17, %cst_9 [1] : vector<64x8xf32> to vector<64xf32>
    %19 = vector.shape_cast %18 : vector<64xf32> to vector<64x1xf32>
    %20 = arith.mulf %16, %16 : vector<64x8xf32>
    %cst_10 = arith.constant dense<0.000000e+00> : vector<64xf32>
    %21 = vector.multi_reduction <add>, %20, %cst_10 [1] : vector<64x8xf32> to vector<64xf32>
    %22 = vector.shape_cast %21 : vector<64xf32> to vector<64x1xf32>
    %23 = arith.addf %19, %22 : vector<64x1xf32>
    %cst_11 = arith.constant 6.250000e-02 : f32
    %24 = vector.broadcast %cst_11 : f32 to vector<64x1xf32>
    %25 = arith.mulf %23, %24 : vector<64x1xf32>
    %cst_12 = arith.constant 9.99999974E-6 : f32
    %26 = vector.broadcast %cst_12 : f32 to vector<64x1xf32>
    %27 = arith.addf %25, %26 : vector<64x1xf32>
    %28 = math.rsqrt %27 : vector<64x1xf32>
    %29 = vector.broadcast %28 : vector<64x1xf32> to vector<64x8xf32>
    %30 = arith.mulf %14, %29 : vector<64x8xf32>
    %31 = vector.broadcast %28 : vector<64x1xf32> to vector<64x8xf32>
    %32 = arith.mulf %16, %31 : vector<64x8xf32>
    %c0_13 = arith.constant 0 : index
    %c0_14 = arith.constant 0 : index
    %33 = vector.load %arg3[%c0_13, %c0_14] : memref<8x8xf32, #tpu.memory_space<vmem>>, vector<8x8xf32>
    %cst_15 = arith.constant dense<0.000000e+00> : vector<64x8xf32>
    %34 = tpu.matmul %30, %33, %cst_15 {dimension_numbers = #tpu.dot_dimension_numbers<[1], [0], [0], [1], [0, 0, 1, 1], [], []>} : vector<64x8xf32>, vector<8x8xf32>, vector<64x8xf32> -> vector<64x8xf32>
    %c0_16 = arith.constant 0 : index
    %c0_17 = arith.constant 0 : index
    %35 = vector.load %arg4[%c0_16, %c0_17] : memref<8x8xf32, #tpu.memory_space<vmem>>, vector<8x8xf32>
    %cst_18 = arith.constant dense<0.000000e+00> : vector<64x8xf32>
    %36 = tpu.matmul %32, %35, %cst_18 {dimension_numbers = #tpu.dot_dimension_numbers<[1], [0], [0], [1], [0, 0, 1, 1], [], []>} : vector<64x8xf32>, vector<8x8xf32>, vector<64x8xf32> -> vector<64x8xf32>
    %37 = arith.addf %34, %36 : vector<64x8xf32>
    %c0_19 = arith.constant 0 : index
    %c0_20 = arith.constant 0 : index
    %38 = vector.load %arg5[%c0_19, %c0_20] : memref<1x8xf32, #tpu.memory_space<vmem>>, vector<1x8xf32>
    %39 = vector.broadcast %38 : vector<1x8xf32> to vector<64x8xf32>
    %40 = arith.addf %37, %39 : vector<64x8xf32>
    %c0_21 = arith.constant 0 : index
    %c0_22 = arith.constant 0 : index
    %41 = vector.load %arg6[%c0_21, %c0_22] : memref<64x8xf32, #tpu.memory_space<vmem>>, vector<64x8xf32>
    tpu.vector_store %arg6[%c0_21, %c0_22], %40 {strides = array<i32>} : memref<64x8xf32, #tpu.memory_space<vmem>>, vector<64x8xf32>,
    return
  }
  func.func @transform_0(%arg0: i32) -> (i32, i32, i32, i32) {
    %c0_i32 = arith.constant 0 : i32
    %c0_i32_0 = arith.constant 0 : i32
    %c0_i32_1 = arith.constant 0 : i32
    %c0_i32_2 = arith.constant 0 : i32
    return %arg0, %c0_i32, %c0_i32_0, %c0_i32_1 : i32, i32, i32, i32
  }
  func.func @transform_1(%arg0: i32) -> (i32, i32, i32, i32) {
    %c1_i32 = arith.constant 1 : i32
    %c0_i32 = arith.constant 0 : i32
    %c0_i32_0 = arith.constant 0 : i32
    %c0_i32_1 = arith.constant 0 : i32
    return %arg0, %c1_i32, %c0_i32, %c0_i32_0 : i32, i32, i32, i32
  }
  func.func @transform_2(%arg0: i32) -> (i32, i32) {
    %c0_i32 = arith.constant 0 : i32
    %c0_i32_0 = arith.constant 0 : i32
    %c0_i32_1 = arith.constant 0 : i32
    return %c0_i32, %c0_i32_0 : i32, i32
  }
  func.func @transform_3(%arg0: i32) -> (i32, i32) {
    %c0_i32 = arith.constant 0 : i32
    %c0_i32_0 = arith.constant 0 : i32
    %c0_i32_1 = arith.constant 0 : i32
    return %c0_i32, %c0_i32_0 : i32, i32
  }
  func.func @transform_4(%arg0: i32) -> (i32, i32) {
    %c0_i32 = arith.constant 0 : i32
    %c0_i32_0 = arith.constant 0 : i32
    %c0_i32_1 = arith.constant 0 : i32
    return %c0_i32, %c0_i32_0 : i32, i32
  }
  func.func @transform_5(%arg0: i32) -> (i32, i32) {
    %c0_i32 = arith.constant 0 : i32
    %c0_i32_0 = arith.constant 0 : i32
    return %arg0, %c0_i32 : i32, i32
  }
}

module attributes {stable_mosaic.version = 11 : i64} {
  func.func @_slab_merge_kernel(%arg0: i32, %arg1: memref<128x16xf32, #tpu.memory_space<vmem>>, %arg2: memref<16x8xf32, #tpu.memory_space<vmem>>, %arg3: memref<1x8xf32, #tpu.memory_space<vmem>>, %arg4: memref<128x8xf32, #tpu.memory_space<vmem>>) attributes {dimension_semantics = [#tpu.dimension_semantics<parallel>], iteration_bounds = array<i64: 1>, scalar_prefetch = 0 : i64, scratch_operands = 0 : i64, tpu.core_type = #tpu.core_type<tc>, window_params = [{transform_indices = @transform_0, window_bounds = array<i64: 128, 16>}, {pipeline_mode = #tpu.pipeline_mode<synchronous>, transform_indices = @transform_1, window_bounds = array<i64: 16, 8>}, {pipeline_mode = #tpu.pipeline_mode<synchronous>, transform_indices = @transform_2, window_bounds = array<i64: 1, 8>}, {transform_indices = @transform_3, window_bounds = array<i64: 128, 8>}]} {
    %c0 = arith.constant 0 : index
    %c0_0 = arith.constant 0 : index
    %0 = vector.load %arg1[%c0, %c0_0] : memref<128x16xf32, #tpu.memory_space<vmem>>, vector<128x16xf32>
    %cst = arith.constant dense<0.000000e+00> : vector<128xf32>
    %1 = vector.multi_reduction <add>, %0, %cst [1] : vector<128x16xf32> to vector<128xf32>
    %2 = vector.shape_cast %1 : vector<128xf32> to vector<128x1xf32>
    %cst_1 = arith.constant 1.600000e+01 : f32
    %3 = vector.broadcast %cst_1 : f32 to vector<128x1xf32>
    %4 = arith.divf %2, %3 : vector<128x1xf32>
    %5 = vector.broadcast %4 : vector<128x1xf32> to vector<128x16xf32>
    %6 = arith.subf %0, %5 : vector<128x16xf32>
    %7 = arith.mulf %6, %6 : vector<128x16xf32>
    %cst_2 = arith.constant dense<0.000000e+00> : vector<128xf32>
    %8 = vector.multi_reduction <add>, %7, %cst_2 [1] : vector<128x16xf32> to vector<128xf32>
    %9 = vector.shape_cast %8 : vector<128xf32> to vector<128x1xf32>
    %cst_3 = arith.constant 1.600000e+01 : f32
    %10 = vector.broadcast %cst_3 : f32 to vector<128x1xf32>
    %11 = arith.divf %9, %10 : vector<128x1xf32>
    %cst_4 = arith.constant 9.99999974E-6 : f32
    %12 = vector.broadcast %cst_4 : f32 to vector<128x1xf32>
    %13 = arith.addf %11, %12 : vector<128x1xf32>
    %14 = math.rsqrt %13 : vector<128x1xf32>
    %15 = vector.broadcast %14 : vector<128x1xf32> to vector<128x16xf32>
    %16 = arith.mulf %6, %15 : vector<128x16xf32>
    %c0_5 = arith.constant 0 : index
    %c0_6 = arith.constant 0 : index
    %17 = vector.load %arg2[%c0_5, %c0_6] : memref<16x8xf32, #tpu.memory_space<vmem>>, vector<16x8xf32>
    %cst_7 = arith.constant dense<0.000000e+00> : vector<128x8xf32>
    %18 = tpu.matmul %16, %17, %cst_7 {dimension_numbers = #tpu.dot_dimension_numbers<[1], [0], [0], [1], [0, 0, 1, 1], [], []>} : vector<128x16xf32>, vector<16x8xf32>, vector<128x8xf32> -> vector<128x8xf32>
    %c0_8 = arith.constant 0 : index
    %c0_9 = arith.constant 0 : index
    %19 = vector.load %arg3[%c0_8, %c0_9] : memref<1x8xf32, #tpu.memory_space<vmem>>, vector<1x8xf32>
    %20 = vector.broadcast %19 : vector<1x8xf32> to vector<128x8xf32>
    %21 = arith.addf %18, %20 : vector<128x8xf32>
    %c0_10 = arith.constant 0 : index
    %c0_11 = arith.constant 0 : index
    %22 = vector.load %arg4[%c0_10, %c0_11] : memref<128x8xf32, #tpu.memory_space<vmem>>, vector<128x8xf32>
    tpu.vector_store %arg4[%c0_10, %c0_11], %21 {strides = array<i32>} : memref<128x8xf32, #tpu.memory_space<vmem>>, vector<128x8xf32>,
    return
  }
  func.func @transform_0(%arg0: i32) -> (i32, i32) {
    %c0_i32 = arith.constant 0 : i32
    %c0_i32_0 = arith.constant 0 : i32
    return %arg0, %c0_i32 : i32, i32
  }
  func.func @transform_1(%arg0: i32) -> (i32, i32) {
    %c0_i32 = arith.constant 0 : i32
    %c0_i32_0 = arith.constant 0 : i32
    %c0_i32_1 = arith.constant 0 : i32
    return %c0_i32, %c0_i32_0 : i32, i32
  }
  func.func @transform_2(%arg0: i32) -> (i32, i32) {
    %c0_i32 = arith.constant 0 : i32
    %c0_i32_0 = arith.constant 0 : i32
    %c0_i32_1 = arith.constant 0 : i32
    return %c0_i32, %c0_i32_0 : i32, i32
  }
  func.func @transform_3(%arg0: i32) -> (i32, i32) {
    %c0_i32 = arith.constant 0 : i32
    %c0_i32_0 = arith.constant 0 : i32
    return %arg0, %c0_i32 : i32, i32
  }
}

</mosaic_0001>

<bundles_post_ra>
// kernel: tpu_custom_call.1
= control target key start
LH: loop header
LB: loop body
LE: loop exit
PB: predicated region body
PF: predicated region fallthrough
CT: control target
= control target key end

     0   :  { %s1145_s18 = smov 0   ;;  %s1147_s19 = smov 0   ;;  %s1429_s0 = inlined_call_operand.vmem [shape: f32[16,2,8,8], index: 0, kind: input, shape index: {}]   ;;  %s1430_s1 = inlined_call_operand.vmem [shape: f32[16,2,8,8], index: 1, kind: input, shape index: {}]   ;;  %s1431_s2 = inlined_call_operand.vmem [shape: f32[8,8], index: 2, kind: input, shape index: {}]   ;;  %s1432_s3 = inlined_call_operand.vmem [shape: f32[8,8], index: 3, kind: input, shape index: {}]   ;;  %s1433_s4 = inlined_call_operand.vmem [shape: f32[1,8], index: 4, kind: input, shape index: {}]   ;;  %s1434_s5 = inlined_call_operand.vmem [shape: f32[128,8], index: 5, kind: output, shape index: {}]  }
   0x1   :  { %s1149_s20 = smov 0  }
   0x2 LB: > { %s951_s21 = sadd.s32 4294967295, %s1113_s20   ;;  %s1162_s22 = sadd.s32 1, %s1113_s20   ;;  %s1113_s20 = sphi %s1149_s20, %s1438_s20   ;;  %s1109_s19 = sphi %s1147_s19, %s1437_s19   ;;  %s1105_s18 = sphi %s1145_s18, %s1436_s18  }
   0x3   : > { %s19_s23 = ssub.s32 %s1113_s20, %s1162_s22  ;;  %s22_s24 = sadd.s32 1, %s1109_s19 }
   0x4   : > { %p20_p0 = scmp.eq.s32.totalorder %s19_s23, 0  ;;  %p29_p1 = scmp.ne.s32.totalorder %s1109_s19, %s1105_s18 }
   0x5   : > { %p30_p2 = scmp.eq.s32.totalorder %s1113_s20, 0  ;;  %p954_p4 = scmp.ge.s32.totalorder %s1113_s20, 2 }
   0x6   : > { %s1171_s25 = scalar_select %p20_p0, %s1109_s19, %s22_s24  }
   0x7   : > { %p1173_p3 = por %p30_p2, %p29_p1  ;;  %179 = sbr.rel (%p954_p4) target bundleno = 30 (0x1e), region = 28 }
   0xe   : > { %182 = sbr.rel (!%p1173_p3) target bundleno = 22 (0x16), region = 32  ;;  %s184_s27 = sand.u32 (%p1173_p3), 1, %s1109_s19  }
   0xf   : > { %s995_s28 = sshll.u32 (%p1173_p3), %s1113_s20, 7  ;;  %s955_s29 = sshll.u32 (%p1173_p3), %s184_s27, 6 }
  0x10   : > { %s190_s7 = scalar_lea.vmem (%p1173_p3), %s1429_s0, %s995_s28  ;;  %s186_s8 = scalar_lea.vmem (%p1173_p3), [#allocation2], %s955_s29 }
  0x11   : > { %v232_v0 = vld [vmem:[%s190_s7] sm:$0xff] (%p1173_p3)  ;;  %v234_v1 = vld [vmem:[%s190_s7 + $0x10] sm:$0xff] (%p1173_p3) }
  0x12   : > { %v236_v2 = vld [vmem:[%s190_s7 + $0x20] sm:$0xff] (%p1173_p3)  ;;  %233 = vst [vmem:[%s186_s8] sm:$0xff] (%p1173_p3), %v232_v0  ;;  %235 = vst [vmem:[%s186_s8 + $0x8] sm:$0xff] (%p1173_p3), %v234_v1  ;;  %v238_v3 = vld [vmem:[%s190_s7 + $0x30] sm:$0xff] (%p1173_p3) }
  0x13   : > { %237 = vst [vmem:[%s186_s8 + $0x10] sm:$0xff] (%p1173_p3), %v236_v2  ;;  %v240_v4 = vld [vmem:[%s190_s7 + $0x40] sm:$0xff] (%p1173_p3)  ;;  %v242_v5 = vld [vmem:[%s190_s7 + $0x50] sm:$0xff] (%p1173_p3)  ;;  %239 = vst [vmem:[%s186_s8 + $0x18] sm:$0xff] (%p1173_p3), %v238_v3 }
  0x14   : > { %241 = vst [vmem:[%s186_s8 + $0x20] sm:$0xff] (%p1173_p3), %v240_v4  ;;  %243 = vst [vmem:[%s186_s8 + $0x28] sm:$0xff] (%p1173_p3), %v242_v5  ;;  %v244_v6 = vld [vmem:[%s190_s7 + $0x60] sm:$0xff] (%p1173_p3)  ;;  %v246_v7 = vld [vmem:[%s190_s7 + $0x70] sm:$0xff] (%p1173_p3) }
  0x15   : > { %245 = vst [vmem:[%s186_s8 + $0x30] sm:$0xff] %v244_v6  ;;  %247 = vst [vmem:[%s186_s8 + $0x38] sm:$0xff] %v246_v7 }
  0x16 PF: > { %253 = sbr.rel (!%p1173_p3) target bundleno = 30 (0x1e), region = 70  ;;  %s255_s9 = sand.u32 (%p1173_p3), 1, %s1109_s19  }
  0x17   : > { %s996_s10 = sshll.u32 (%p1173_p3), %s1113_s20, 7  ;;  %s959_s11 = sshll.u32 (%p1173_p3), %s255_s9, 6 }
  0x18   : > { %s899_s14 = scalar_lea.vmem (%p1173_p3), %s1430_s1, %s996_s10  ;;  %s257_s15 = scalar_lea.vmem (%p1173_p3), [#allocation3], %s959_s11 }
  0x19   : > { %v962_v8 = vld [vmem:[%s899_s14 + $0x8] sm:$0xff] (%p1173_p3)  ;;  %v963_v9 = vld [vmem:[%s899_s14 + $0x18] sm:$0xff] (%p1173_p3) }
  0x1a   : > { %v964_v10 = vld [vmem:[%s899_s14 + $0x28] sm:$0xff] (%p1173_p3)  ;;  %305 = vst [vmem:[%s257_s15] sm:$0xff] (%p1173_p3), %v962_v8  ;;  %307 = vst [vmem:[%s257_s15 + $0x8] sm:$0xff] (%p1173_p3), %v963_v9  ;;  %v965_v11 = vld [vmem:[%s899_s14 + $0x38] sm:$0xff] (%p1173_p3) }
  0x1b   : > { %309 = vst [vmem:[%s257_s15 + $0x10] sm:$0xff] (%p1173_p3), %v964_v10  ;;  %v966_v12 = vld [vmem:[%s899_s14 + $0x48] sm:$0xff] (%p1173_p3)  ;;  %v967_v13 = vld [vmem:[%s899_s14 + $0x58] sm:$0xff] (%p1173_p3)  ;;  %311 = vst [vmem:[%s257_s15 + $0x18] sm:$0xff] (%p1173_p3), %v965_v11 }
  0x1c   : > { %313 = vst [vmem:[%s257_s15 + $0x20] sm:$0xff] (%p1173_p3), %v966_v12  ;;  %315 = vst [vmem:[%s257_s15 + $0x28] sm:$0xff] (%p1173_p3), %v967_v13  ;;  %v968_v14 = vld [vmem:[%s899_s14 + $0x68] sm:$0xff] (%p1173_p3)  ;;  %v969_v15 = vld [vmem:[%s899_s14 + $0x78] sm:$0xff] (%p1173_p3) }
  0x1d   : > { %317 = vst [vmem:[%s257_s15 + $0x30] sm:$0xff] %v968_v14  ;;  %319 = vst [vmem:[%s257_s15 + $0x38] sm:$0xff] %v969_v15 }
  0x1e PF: > { %p970_p5 = scmp.ge.s32.totalorder %s1113_s20, 1  ;;  %p324_p6 = scmp.lt.s32.totalorder %s1113_s20, 3 }
  0x20   : > { %p325_p7 = pnand %p970_p5, %p324_p6 }
  0x21   : > { %s331_s16 = sand.u32 (!%p325_p7), 1, %s1105_s18   ;;  %vm393_vm0 = vcmask (!%p325_p7), 64512   ;;  %s973_s29 = sshll.u32 (!%p325_p7), %s951_s21, 3 }
  0x22   : > { %328 = sbr.rel (%p325_p7) target bundleno = 600 (0x258), region = 108  ;;  %s971_s17 = sshll.u32 (!%p325_p7), %s331_s16, 6 }
  0x23   : > { %s1195_s23 = scalar_lea.vmem (!%p325_p7), [#allocation2], %s971_s17  ;;  %s1199_s24 = scalar_lea.vmem (!%p325_p7), [#allocation3], %s971_s17 }
  0x24   : > { %v378_v16 = vld [vmem:[%s1195_s23 + $0x8] sm:$0xff] (!%p325_p7)  ;;  %v377_v17 = vld [vmem:[%s1195_s23] sm:$0xff] (!%p325_p7)  ;;  %v1208_v24 = vld [vmem:[%s1199_s24 + $0x10] sm:$0xff] (!%p325_p7)  ;;  %p372_p8 = scmp.lt.s32.totalorder (!%p325_p7), %s973_s29, 15 }
  0x25   : > { %v386_v18 = vld [vmem:[%s1199_s24 + $0x8] sm:$0xff] (!%p325_p7)  ;;  %v397_v19 = vsel (!%p325_p7), %vm393_vm0, %v378_v16, 0.0  ;;  %v394_v20 = vsel (!%p325_p7), %vm393_vm0, %v377_v17, 0.0  ;;  %v385_v21 = vld [vmem:[%s1199_s24] sm:$0xff] (!%p325_p7)  ;;  %v379_v25 = vld [vmem:[%s1195_s23 + $0x10] sm:$0xff] (!%p325_p7)  ;;  %v424_v26 = vsel (!%p325_p7), %vm393_vm0, %v1208_v24, 0.0 }
  0x26   : > { %398 = vadd.xlane.f32.xlu1 (!%p325_p7), %v397_v19  ;;  %395 = vadd.xlane.f32.xlu0 (!%p325_p7), %v394_v20  ;;  %v421_v22 = vsel (!%p325_p7), %vm393_vm0, %v386_v18, 0.0  ;;  %v418_v23 = vsel (!%p325_p7), %vm393_vm0, %v385_v21, 0.0  ;;  %v400_v27 = vsel (!%p325_p7), %vm393_vm0, %v379_v25, 0.0  ;;  %v1215_v28 = vld [vmem:[%s1199_s24 + $0x18] sm:$0xff] (!%p325_p7)  ;;  %v1225_v32 = vld [vmem:[%s1199_s24 + $0x20] sm:$0xff] (!%p325_p7)  ;;  %v1235_v36 = vld [vmem:[%s1199_s24 + $0x28] sm:$0xff] (!%p325_p7) }
  0x27   : > { %v1218_v29 = vld [vmem:[%s1195_s23 + $0x18] sm:$0xff] (!%p325_p7)  ;;  %v427_v30 = vsel (!%p325_p7), %vm393_vm0, %v1215_v28, 0.0  ;;  %v1228_v33 = vld [vmem:[%s1195_s23 + $0x20] sm:$0xff] (!%p325_p7)  ;;  %v430_v34 = vsel (!%p325_p7), %vm393_vm0, %v1225_v32, 0.0  ;;  %v1238_v37 = vld [vmem:[%s1195_s23 + $0x28] sm:$0xff] (!%p325_p7)  ;;  %v433_v38 = vsel (!%p325_p7), %vm393_vm0, %v1235_v36, 0.0 }
  0x28   : > { %v403_v31 = vsel (!%p325_p7), %vm393_vm0, %v1218_v29, 0.0  ;;  %v406_v35 = vsel (!%p325_p7), %vm393_vm0, %v1228_v33, 0.0  ;;  %v409_v39 = vsel (!%p325_p7), %vm393_vm0, %v1238_v37, 0.0  ;;  %v1245_v40 = vld [vmem:[%s1199_s24 + $0x30] sm:$0xff] (!%p325_p7)  ;;  %v1255_v44 = vld [vmem:[%s1199_s24 + $0x38] sm:$0xff] (!%p325_p7) }
  0x29   : > { %v1248_v41 = vld [vmem:[%s1195_s23 + $0x30] sm:$0xff]  ;;  %v436_v42 = vsel %vm393_vm0, %v1245_v40, 0.0  ;;  %v1258_v45 = vld [vmem:[%s1195_s23 + $0x38] sm:$0xff]  ;;  %v439_v46 = vsel %vm393_vm0, %v1255_v44, 0.0  ;;  %s1440_s29 = smov (!%p372_p8, %s973_s29), 15 }
  0x2a   : > { %422 = vadd.xlane.f32.xlu1 %v421_v22  ;;  %419 = vadd.xlane.f32.xlu0 %v418_v23  ;;  %v412_v43 = vsel %vm393_vm0, %v1248_v41, 0.0  ;;  %v415_v47 = vsel %vm393_vm0, %v1258_v45, 0.0  ;;  %s974_s30 = sshll.u32 %s1440_s29, 3 }
  0x2b   : > { %s1401_s10 = scalar_lea.vmem %s1434_s5, %s974_s30 }
  0x2e   : > { %425 = vadd.xlane.f32.xlu1 %v424_v26  ;;  %401 = vadd.xlane.f32.xlu0 %v400_v27 }
  0x32   : > { %428 = vadd.xlane.f32.xlu1 %v427_v30  ;;  %404 = vadd.xlane.f32.xlu0 %v403_v31 }
  0x36   : > { %431 = vadd.xlane.f32.xlu1 %v430_v34  ;;  %407 = vadd.xlane.f32.xlu0 %v406_v35 }
  0x3a   : > { %434 = vadd.xlane.f32.xlu1 %v433_v38  ;;  %410 = vadd.xlane.f32.xlu0 %v409_v39 }
  0x3e   : > { %437 = vadd.xlane.f32.xlu1 %v436_v42  ;;  %413 = vadd.xlane.f32.xlu0 %v412_v43 }
  0x42   : > { %440 = vadd.xlane.f32.xlu1 %v439_v46  ;;  %416 = vadd.xlane.f32.xlu0 %v415_v47 }
  0xb3   : > { %v399_v48 = vpop.xlane.xlu1 %398  ;;  %v396_v49 = vpop.xlane.xlu0 %395 }
  0xb7   : > { %v423_v50 = vpop.xlane.xlu1 %422  ;;  %v420_v51 = vpop.xlane.xlu0 %419 }
  0xb8   : > { %v443_v52 = vadd.f32 %v423_v50, %v399_v48  ;;  %v442_v53 = vadd.f32 %v420_v51, %v396_v49 }
  0xba   : > { %v451_v54 = vmul.f32 0.0625, %v443_v52  ;;  %v450_v55 = vmul.f32 0.0625, %v442_v53 }
  0xbb   : > { %v426_v56 = vpop.xlane.xlu1 %425  ;;  %v402_v57 = vpop.xlane.xlu0 %401 }
  0xbc   : > { %v1264_v58 = vsub.f32 %v378_v16, %v451_v54  ;;  %v1266_v59 = vsub.f32 %v386_v18, %v451_v54  ;;  %v1268_v60 = vsub.f32 %v377_v17, %v450_v55  ;;  %v1270_v61 = vsub.f32 %v385_v21, %v450_v55 }
  0xbd   : > { %v444_v62 = vadd.f32 %v426_v56, %v402_v57 }
  0xbe   : > { %v506_v63 = vmul.f32 %v1270_v61, %v1270_v61  ;;  %v474_v0 = vmul.f32 %v1268_v60, %v1268_v60  ;;  %v507_v4 = vmul.f32 %v1266_v59, %v1266_v59  ;;  %v475_v8 = vmul.f32 %v1264_v58, %v1264_v58 }
  0xbf   : > { %v452_v1 = vmul.f32 0.0625, %v444_v62  ;;  %v429_v2 = vpop.xlane.xlu1 %428  ;;  %v405_v3 = vpop.xlane.xlu0 %404 }
  0xc0   : > { %v514_v5 = vsel %vm393_vm0, %v506_v63, 0.0  ;;  %v482_v6 = vsel %vm393_vm0, %v474_v0, 0.0  ;;  %v445_v7 = vadd.f32 %v429_v2, %v405_v3  ;;  %v517_v12 = vsel %vm393_vm0, %v507_v4, 0.0 }
  0xc1   : > { %v1282_v9 = vsub.f32 %v379_v25, %v452_v1  ;;  %v1285_v10 = vsub.f32 %v1208_v24, %v452_v1  ;;  %515 = vadd.xlane.f32.xlu1 %v514_v5  ;;  %483 = vadd.xlane.f32.xlu0 %v482_v6  ;;  %v485_v19 = vsel %vm393_vm0, %v475_v8, 0.0  ;;  %v586_v5 = vld [vmem:[%s1431_s2] sm:$0xff] }
  0xc2   : > { %v453_v11 = vmul.f32 0.0625, %v445_v7  ;;  %1029 = vmatprep.subr.mxu0 %v586_v5 }
  0xc3   : > { %v432_v13 = vpop.xlane.xlu1 %431  ;;  %v408_v14 = vpop.xlane.xlu0 %407  ;;  %v508_v15 = vmul.f32 %v1285_v10, %v1285_v10  ;;  %v476_v16 = vmul.f32 %v1282_v9, %v1282_v9  ;;  %1030 = vmatpush3.msra.mxu0 %v586_v5 }
  0xc4   : > { %v1293_v17 = vsub.f32 %v1218_v29, %v453_v11  ;;  %v1296_v18 = vsub.f32 %v1215_v28, %v453_v11  ;;  %v446_v20 = vadd.f32 %v432_v13, %v408_v14 }
  0xc5   : > { %518 = vadd.xlane.f32.xlu1 %v517_v12  ;;  %486 = vadd.xlane.f32.xlu0 %v485_v19  ;;  %v520_v21 = vsel %vm393_vm0, %v508_v15, 0.0  ;;  %v488_v23 = vsel %vm393_vm0, %v476_v16, 0.0 }
  0xc6   : > { %v454_v22 = vmul.f32 0.0625, %v446_v20  ;;  %v509_v24 = vmul.f32 %v1296_v18, %v1296_v18  ;;  %v477_v25 = vmul.f32 %v1293_v17, %v1293_v17 }
  0xc7   : > { %v435_v26 = vpop.xlane.xlu1 %434  ;;  %v411_v27 = vpop.xlane.xlu0 %410 }
  0xc8   : > { %v1306_v28 = vsub.f32 %v1228_v33, %v454_v22  ;;  %v1309_v29 = vsub.f32 %v1225_v32, %v454_v22  ;;  %v447_v30 = vadd.f32 %v435_v26, %v411_v27  ;;  %v523_v31 = vsel %vm393_vm0, %v509_v24, 0.0 }
  0xc9   : > { %521 = vadd.xlane.f32.xlu1 %v520_v21  ;;  %489 = vadd.xlane.f32.xlu0 %v488_v23  ;;  %v491_v35 = vsel %vm393_vm0, %v477_v25, 0.0 }
  0xca   : > { %v455_v34 = vmul.f32 0.0625, %v447_v30  ;;  %v510_v38 = vmul.f32 %v1309_v29, %v1309_v29  ;;  %v478_v39 = vmul.f32 %v1306_v28, %v1306_v28 }
  0xcb   : > { %v438_v42 = vpop.xlane.xlu1 %437  ;;  %v414_v33 = vpop.xlane.xlu0 %413 }
  0xcc   : > { %v1318_v43 = vsub.f32 %v1238_v37, %v455_v34  ;;  %v1321_v32 = vsub.f32 %v1235_v36, %v455_v34  ;;  %v448_v46 = vadd.f32 %v438_v42, %v414_v33  ;;  %v526_v47 = vsel %vm393_vm0, %v510_v38, 0.0 }
  0xcd   : > { %524 = vadd.xlane.f32.xlu1 %v523_v31  ;;  %492 = vadd.xlane.f32.xlu0 %v491_v35  ;;  %v494_v49 = vsel %vm393_vm0, %v478_v39, 0.0 }
  0xce   : > { %v456_v48 = vmul.f32 0.0625, %v448_v46  ;;  %v511_v50 = vmul.f32 %v1321_v32, %v1321_v32  ;;  %v479_v51 = vmul.f32 %v1318_v43, %v1318_v43 }
  0xcf   : > { %v441_v52 = vpop.xlane.xlu1 %440  ;;  %v417_v37 = vpop.xlane.xlu0 %416 }
  0xd0   : > { %v1330_v53 = vsub.f32 %v1248_v41, %v456_v48  ;;  %v1333_v36 = vsub.f32 %v1245_v40, %v456_v48  ;;  %v449_v54 = vadd.f32 %v441_v52, %v417_v37  ;;  %v529_v55 = vsel %vm393_vm0, %v511_v50, 0.0 }
  0xd1   : > { %527 = vadd.xlane.f32.xlu1 %v526_v47  ;;  %495 = vadd.xlane.f32.xlu0 %v494_v49  ;;  %v497_v57 = vsel %vm393_vm0, %v479_v51, 0.0 }
  0xd2   : > { %v457_v56 = vmul.f32 0.0625, %v449_v54  ;;  %v512_v62 = vmul.f32 %v1333_v36, %v1333_v36  ;;  %v480_v63 = vmul.f32 %v1330_v53, %v1330_v53 }
  0xd4   : > { %v1342_v41 = vsub.f32 %v1258_v45, %v457_v56  ;;  %v1345_v40 = vsub.f32 %v1255_v44, %v457_v56  ;;  %v532_v0 = vsel %vm393_vm0, %v512_v62, 0.0  ;;  %v500_v1 = vsel %vm393_vm0, %v480_v63, 0.0  ;;  %v587_v44 = vld [vmem:[%s1432_s3] sm:$0xff] }
  0xd5   : > { %530 = vadd.xlane.f32.xlu1 %v529_v55  ;;  %498 = vadd.xlane.f32.xlu0 %v497_v57 }
  0xd6   : > { %v513_v2 = vmul.f32 %v1345_v40, %v1345_v40  ;;  %v481_v3 = vmul.f32 %v1342_v41, %v1342_v41  ;;  %1015 = vmatprep.subr.mxu1 %v587_v44 }
  0xd7   : > { %1016 = vmatpush3.msra.mxu1 %v587_v44 }
  0xd8   : > { %v535_v45 = vsel %vm393_vm0, %v513_v2, 0.0  ;;  %v503_v4 = vsel %vm393_vm0, %v481_v3, 0.0 }
  0xd9   : > { %533 = vadd.xlane.f32.xlu1 %v532_v0  ;;  %501 = vadd.xlane.f32.xlu0 %v500_v1 }
  0xdd   : > { %536 = vadd.xlane.f32.xlu1 %v535_v45  ;;  %504 = vadd.xlane.f32.xlu0 %v503_v4 }
 0x14e   : > { %v516_v6 = vpop.xlane.xlu1 %515  ;;  %v484_v7 = vpop.xlane.xlu0 %483 }
 0x14f   : > { %v538_v8 = vadd.f32 %v516_v6, %v484_v7 }
 0x151   : > { %v546_v11 = vmul.f32 0.0625, %v538_v8 }
 0x152   : > { %v519_v12 = vpop.xlane.xlu1 %518  ;;  %v487_v13 = vpop.xlane.xlu0 %486 }
 0x153   : > { %v554_v14 = vadd.f32 1e-05, %v546_v11  ;;  %v539_v15 = vadd.f32 %v519_v12, %v487_v13 }
 0x155   : > { %1075 = vrsqrt.f32 %v554_v14  ;;  %v547_v16 = vmul.f32 0.0625, %v539_v15 }
 0x156   : > { %v522_v19 = vpop.xlane.xlu1 %521  ;;  %v490_v20 = vpop.xlane.xlu0 %489 }
 0x157   : > { %v555_v21 = vadd.f32 1e-05, %v547_v16  ;;  %v540_v22 = vadd.f32 %v522_v19, %v490_v20 }
 0x159   : > { %1077 = vrsqrt.f32 %v555_v21  ;;  %v548_v23 = vmul.f32 0.0625, %v540_v22 }
 0x15a   : > { %v525_v24 = vpop.xlane.xlu1 %524  ;;  %v493_v25 = vpop.xlane.xlu0 %492 }
 0x15b   : > { %v556_v26 = vadd.f32 1e-05, %v548_v23  ;;  %v541_v27 = vadd.f32 %v525_v24, %v493_v25 }
 0x15d   : > { %1079 = vrsqrt.f32 %v556_v26  ;;  %v549_v30 = vmul.f32 0.0625, %v541_v27 }
 0x15e   : > { %v528_v31 = vpop.xlane.xlu1 %527  ;;  %v496_v34 = vpop.xlane.xlu0 %495 }
 0x15f   : > { %v1076_v35 = vpop.eup %1075  ;;  %v557_v38 = vadd.f32 1e-05, %v549_v30  ;;  %v542_v39 = vadd.f32 %v528_v31, %v496_v34 }
 0x160   : > { %v578_v42 = vmul.f32 %v1076_v35, %v1270_v61  ;;  %v570_v33 = vmul.f32 %v1076_v35, %v1268_v60 }
 0x161   : > { %1081 = vrsqrt.f32 %v557_v38  ;;  %v550_v46 = vmul.f32 0.0625, %v542_v39 }
 0x162   : > { %v531_v47 = vpop.xlane.xlu1 %530  ;;  %1017 = vmatprep.mubr.msk.f32.mxu1 %vm393_vm0, %v578_v42  ;;  %1031 = vmatprep.mubr.msk.f32.mxu0 %vm393_vm0, %v570_v33  ;;  %v499_v48 = vpop.xlane.xlu0 %498 }
 0x163   : > { %v1078_v49 = vpop.eup %1077  ;;  %v558_v50 = vadd.f32 1e-05, %v550_v46  ;;  %v543_v51 = vadd.f32 %v531_v47, %v499_v48 }
 0x164   : > { %v579_v52 = vmul.f32 %v1078_v49, %v1266_v59  ;;  %v571_v37 = vmul.f32 %v1078_v49, %v1264_v58 }
 0x165   : > { %1083 = vrsqrt.f32 %v558_v50  ;;  %v551_v54 = vmul.f32 0.0625, %v543_v51 }
 0x166   : > { %v534_v61 = vpop.xlane.xlu1 %533  ;;  %1018 = vmatmul.mubr.msk.f32.vlgmr.msra.gmra.mrb[0].mxu1 %vm393_vm0, %v579_v52  ;;  %1032 = vmatmul.mubr.msk.f32.vlgmr.msra.gmra.mrb[0].mxu0 %vm393_vm0, %v571_v37  ;;  %v502_v60 = vpop.xlane.xlu0 %501 }
 0x167   : > { %v1080_v55 = vpop.eup %1079  ;;  %v559_v56 = vadd.f32 1e-05, %v551_v54  ;;  %v544_v57 = vadd.f32 %v534_v61, %v502_v60 }
 0x168   : > { %v580_v62 = vmul.f32 %v1080_v55, %v1285_v10  ;;  %v572_v63 = vmul.f32 %v1080_v55, %v1282_v9 }
 0x169   : > { %1085 = vrsqrt.f32 %v559_v56  ;;  %v552_v0 = vmul.f32 0.0625, %v544_v57 }
 0x16a   : > { %v537_v59 = vpop.xlane.xlu1 %536  ;;  %1020 = vmatprep.mubr.msk.f32.mxu1 %vm393_vm0, %v580_v62  ;;  %1034 = vmatprep.mubr.msk.f32.mxu0 %vm393_vm0, %v572_v63  ;;  %v505_v58 = vpop.xlane.xlu0 %504 }
 0x16b   : > { %v1082_v1 = vpop.eup %1081  ;;  %v560_v2 = vadd.f32 1e-05, %v552_v0  ;;  %v545_v3 = vadd.f32 %v537_v59, %v505_v58 }
 0x16c   : > { %v581_v45 = vmul.f32 %v1082_v1, %v1296_v18  ;;  %v573_v4 = vmul.f32 %v1082_v1, %v1293_v17 }
 0x16d   : > { %1087 = vrsqrt.f32 %v560_v2  ;;  %v553_v44 = vmul.f32 0.0625, %v545_v3 }
 0x16e   : > { %1021 = vmatmul.mubr.msk.f32.gmra.mrb[2].mxu1 %vm393_vm0, %v581_v45  ;;  %1035 = vmatmul.mubr.msk.f32.gmra.mrb[2].mxu0 %vm393_vm0, %v573_v4 }
 0x16f   : > { %v1084_v9 = vpop.eup %1083  ;;  %v561_v10 = vadd.f32 1e-05, %v553_v44 }
 0x170   : > { %v582_v5 = vmul.f32 %v1084_v9, %v1309_v29  ;;  %v574_v6 = vmul.f32 %v1084_v9, %v1306_v28 }
 0x171   : > { %1089 = vrsqrt.f32 %v561_v10 }
 0x172   : > { %1023 = vmatprep.mubr.msk.f32.mxu1 %vm393_vm0, %v582_v5  ;;  %1037 = vmatprep.mubr.msk.f32.mxu0 %vm393_vm0, %v574_v6 }
 0x173   : > { %v1086_v18 = vpop.eup %1085 }
 0x174   : > { %v583_v17 = vmul.f32 %v1086_v18, %v1321_v32  ;;  %v575_v7 = vmul.f32 %v1086_v18, %v1318_v43 }
 0x176   : > { %1024 = vmatmul.mubr.msk.f32.gmra.mrb[4].mxu1 %vm393_vm0, %v583_v17  ;;  %1038 = vmatmul.mubr.msk.f32.gmra.mrb[4].mxu0 %vm393_vm0, %v575_v7 }
 0x177   : > { %v1088_v8 = vpop.eup %1087 }
 0x178   : > { %v584_v29 = vmul.f32 %v1088_v8, %v1333_v36  ;;  %v576_v28 = vmul.f32 %v1088_v8, %v1330_v53  ;;  %v991_v36 = vld [vmem:[%s1433_s4] ss:$0 sm:$0xff] }
 0x17a   : > { %1026 = vmatprep.mubr.msk.f32.mxu1 %vm393_vm0, %v584_v29  ;;  %1040 = vmatprep.mubr.msk.f32.mxu0 %vm393_vm0, %v576_v28 }
 0x17b   : > { %v1090_v11 = vpop.eup %1089 }
 0x17c   : > { %v585_v12 = vmul.f32 %v1090_v11, %v1345_v40  ;;  %v577_v32 = vmul.f32 %v1090_v11, %v1342_v41 }
 0x17e   : > { %1027 = vmatmul.mubr.msk.f32.gmra.mrb[6].mxu1 %vm393_vm0, %v585_v12  ;;  %1041 = vmatmul.mubr.msk.f32.gmra.mrb[6].mxu0 %vm393_vm0, %v577_v32 }
 0x239   : > { %v1019_v43 = vpop.f32.mrb[0].mxu1  ;;  %v1033_v53 = vpop.f32.mrb[0].mxu0 }
 0x23a   : > { %v813_v13 = vadd.f32 %v1033_v53, %v1019_v43  ;;  %v678_v14 = vpop.f32.mrb[1].mxu1  ;;  %v807_v40 = vpop.f32.mrb[1].mxu0 }
 0x23b   : > { %v808_v41 = vadd.f32 %v807_v40, %v678_v14 }
 0x23c   : > { %v854_v15 = vadd.f32 %v991_v36, %v813_v13 }
 0x23d   : > { %v853_v16 = vadd.f32 %v991_v36, %v808_v41 }
 0x23e   : > { %862 = vst.msk [vmem:[%s1401_s10 + $0x8] sm:$0xff] %vm393_vm0, %v854_v15 }
 0x23f   : > { %861 = vst.msk [vmem:[%s1401_s10] sm:$0xff] %vm393_vm0, %v853_v16 }
 0x241   : > { %v1022_v19 = vpop.f32.mrb[2].mxu1  ;;  %v1036_v20 = vpop.f32.mrb[2].mxu0 }
 0x242   : > { %v823_v21 = vadd.f32 %v1036_v20, %v1022_v19  ;;  %v688_v22 = vpop.f32.mrb[3].mxu1  ;;  %v817_v23 = vpop.f32.mrb[3].mxu0 }
 0x243   : > { %v818_v24 = vadd.f32 %v817_v23, %v688_v22 }
 0x244   : > { %v856_v25 = vadd.f32 %v991_v36, %v823_v21 }
 0x245   : > { %v855_v26 = vadd.f32 %v991_v36, %v818_v24 }
 0x246   : > { %864 = vst.msk [vmem:[%s1401_s10 + $0x18] sm:$0xff] %vm393_vm0, %v856_v25 }
 0x247   : > { %863 = vst.msk [vmem:[%s1401_s10 + $0x10] sm:$0xff] %vm393_vm0, %v855_v26 }
 0x249   : > { %v1025_v27 = vpop.f32.mrb[4].mxu1  ;;  %v1039_v30 = vpop.f32.mrb[4].mxu0 }
 0x24a   : > { %v833_v31 = vadd.f32 %v1039_v30, %v1025_v27  ;;  %v698_v34 = vpop.f32.mrb[5].mxu1  ;;  %v827_v35 = vpop.f32.mrb[5].mxu0 }
 0x24b   : > { %v828_v38 = vadd.f32 %v827_v35, %v698_v34 }
 0x24c   : > { %v858_v39 = vadd.f32 %v991_v36, %v833_v31 }
 0x24d   : > { %v857_v42 = vadd.f32 %v991_v36, %v828_v38 }
 0x24e   : > { %866 = vst.msk [vmem:[%s1401_s10 + $0x28] sm:$0xff] %vm393_vm0, %v858_v39 }
 0x24f   : > { %865 = vst.msk [vmem:[%s1401_s10 + $0x20] sm:$0xff] %vm393_vm0, %v857_v42 }
 0x251   : > { %v1028_v33 = vpop.f32.mrb[6].mxu1  ;;  %v1042_v46 = vpop.f32.mrb[6].mxu0 }
 0x252   : > { %v843_v47 = vadd.f32 %v1042_v46, %v1028_v33  ;;  %v708_v48 = vpop.f32.mrb[7].mxu1  ;;  %v837_v49 = vpop.f32.mrb[7].mxu0 }
 0x253   : > { %v838_v50 = vadd.f32 %v837_v49, %v708_v48 }
 0x254   : > { %v860_v51 = vadd.f32 %v991_v36, %v843_v47 }
 0x255   : > { %v859_v52 = vadd.f32 %v991_v36, %v838_v50 }
 0x256   : > { %868 = vst.msk [vmem:[%s1401_s10 + $0x38] sm:$0xff] %vm393_vm0, %v860_v51 }
 0x257   : > { %867 = vst.msk [vmem:[%s1401_s10 + $0x30] sm:$0xff] %vm393_vm0, %v859_v52 }
 0x258 PF: > { %p12_p9 = scmp.ge.s32.totalorder %s1162_s22, 4   ;;  %s1436_s18 = smov %s1109_s19 }
 0x259   : > { %s1437_s19 = smov %s1171_s25  ;;  %s1438_s20 = smov %s1162_s22 }
 0x25a   :  { %14 = sbr.rel (!%p12_p9) target bundleno = 2 (0x2), region = 159 }

// kernel: tpu_custom_call.1
= control target key start
LH: loop header
LB: loop body
LE: loop exit
PB: predicated region body
PF: predicated region fallthrough
CT: control target
= control target key end

     0   :  { %s1145_s18 = smov 0   ;;  %s1147_s19 = smov 0   ;;  %s1429_s0 = inlined_call_operand.vmem [shape: f32[16,2,8,8], index: 0, kind: input, shape index: {}]   ;;  %s1430_s1 = inlined_call_operand.vmem [shape: f32[16,2,8,8], index: 1, kind: input, shape index: {}]   ;;  %s1431_s2 = inlined_call_operand.vmem [shape: f32[8,8], index: 2, kind: input, shape index: {}]   ;;  %s1432_s3 = inlined_call_operand.vmem [shape: f32[8,8], index: 3, kind: input, shape index: {}]   ;;  %s1433_s4 = inlined_call_operand.vmem [shape: f32[1,8], index: 4, kind: input, shape index: {}]   ;;  %s1434_s5 = inlined_call_operand.vmem [shape: f32[128,8], index: 5, kind: output, shape index: {}]  }
   0x1   :  { %s1149_s20 = smov 0  }
   0x2 LB: > { %s951_s21 = sadd.s32 4294967295, %s1113_s20   ;;  %s1162_s22 = sadd.s32 1, %s1113_s20   ;;  %s1113_s20 = sphi %s1149_s20, %s1438_s20   ;;  %s1109_s19 = sphi %s1147_s19, %s1437_s19   ;;  %s1105_s18 = sphi %s1145_s18, %s1436_s18  }
   0x3   : > { %s19_s23 = ssub.s32 %s1113_s20, %s1162_s22  ;;  %s22_s24 = sadd.s32 1, %s1109_s19 }
   0x4   : > { %p20_p0 = scmp.eq.s32.totalorder %s19_s23, 0  ;;  %p29_p1 = scmp.ne.s32.totalorder %s1109_s19, %s1105_s18 }
   0x5   : > { %p30_p2 = scmp.eq.s32.totalorder %s1113_s20, 0  ;;  %p954_p4 = scmp.ge.s32.totalorder %s1113_s20, 2 }
   0x6   : > { %s1171_s25 = scalar_select %p20_p0, %s1109_s19, %s22_s24  }
   0x7   : > { %p1173_p3 = por %p30_p2, %p29_p1  ;;  %179 = sbr.rel (%p954_p4) target bundleno = 30 (0x1e), region = 28 }
   0xe   : > { %182 = sbr.rel (!%p1173_p3) target bundleno = 22 (0x16), region = 32  ;;  %s184_s27 = sand.u32 (%p1173_p3), 1, %s1109_s19  }
   0xf   : > { %s995_s28 = sshll.u32 (%p1173_p3), %s1113_s20, 7  ;;  %s955_s29 = sshll.u32 (%p1173_p3), %s184_s27, 6 }
  0x10   : > { %s190_s7 = scalar_lea.vmem (%p1173_p3), %s1429_s0, %s995_s28  ;;  %s186_s8 = scalar_lea.vmem (%p1173_p3), [#allocation2], %s955_s29 }
  0x11   : > { %v232_v0 = vld [vmem:[%s190_s7] sm:$0xff] (%p1173_p3)  ;;  %v234_v1 = vld [vmem:[%s190_s7 + $0x10] sm:$0xff] (%p1173_p3) }
  0x12   : > { %v236_v2 = vld [vmem:[%s190_s7 + $0x20] sm:$0xff] (%p1173_p3)  ;;  %233 = vst [vmem:[%s186_s8] sm:$0xff] (%p1173_p3), %v232_v0  ;;  %235 = vst [vmem:[%s186_s8 + $0x8] sm:$0xff] (%p1173_p3), %v234_v1  ;;  %v238_v3 = vld [vmem:[%s190_s7 + $0x30] sm:$0xff] (%p1173_p3) }
  0x13   : > { %237 = vst [vmem:[%s186_s8 + $0x10] sm:$0xff] (%p1173_p3), %v236_v2  ;;  %v240_v4 = vld [vmem:[%s190_s7 + $0x40] sm:$0xff] (%p1173_p3)  ;;  %v242_v5 = vld [vmem:[%s190_s7 + $0x50] sm:$0xff] (%p1173_p3)  ;;  %239 = vst [vmem:[%s186_s8 + $0x18] sm:$0xff] (%p1173_p3), %v238_v3 }
  0x14   : > { %241 = vst [vmem:[%s186_s8 + $0x20] sm:$0xff] (%p1173_p3), %v240_v4  ;;  %243 = vst [vmem:[%s186_s8 + $0x28] sm:$0xff] (%p1173_p3), %v242_v5  ;;  %v244_v6 = vld [vmem:[%s190_s7 + $0x60] sm:$0xff] (%p1173_p3)  ;;  %v246_v7 = vld [vmem:[%s190_s7 + $0x70] sm:$0xff] (%p1173_p3) }
  0x15   : > { %245 = vst [vmem:[%s186_s8 + $0x30] sm:$0xff] %v244_v6  ;;  %247 = vst [vmem:[%s186_s8 + $0x38] sm:$0xff] %v246_v7 }
  0x16 PF: > { %253 = sbr.rel (!%p1173_p3) target bundleno = 30 (0x1e), region = 70  ;;  %s255_s9 = sand.u32 (%p1173_p3), 1, %s1109_s19  }
  0x17   : > { %s996_s10 = sshll.u32 (%p1173_p3), %s1113_s20, 7  ;;  %s959_s11 = sshll.u32 (%p1173_p3), %s255_s9, 6 }
  0x18   : > { %s899_s14 = scalar_lea.vmem (%p1173_p3), %s1430_s1, %s996_s10  ;;  %s257_s15 = scalar_lea.vmem (%p1173_p3), [#allocation3], %s959_s11 }
  0x19   : > { %v962_v8 = vld [vmem:[%s899_s14 + $0x8] sm:$0xff] (%p1173_p3)  ;;  %v963_v9 = vld [vmem:[%s899_s14 + $0x18] sm:$0xff] (%p1173_p3) }
  0x1a   : > { %v964_v10 = vld [vmem:[%s899_s14 + $0x28] sm:$0xff] (%p1173_p3)  ;;  %305 = vst [vmem:[%s257_s15] sm:$0xff] (%p1173_p3), %v962_v8  ;;  %307 = vst [vmem:[%s257_s15 + $0x8] sm:$0xff] (%p1173_p3), %v963_v9  ;;  %v965_v11 = vld [vmem:[%s899_s14 + $0x38] sm:$0xff] (%p1173_p3) }
  0x1b   : > { %309 = vst [vmem:[%s257_s15 + $0x10] sm:$0xff] (%p1173_p3), %v964_v10  ;;  %v966_v12 = vld [vmem:[%s899_s14 + $0x48] sm:$0xff] (%p1173_p3)  ;;  %v967_v13 = vld [vmem:[%s899_s14 + $0x58] sm:$0xff] (%p1173_p3)  ;;  %311 = vst [vmem:[%s257_s15 + $0x18] sm:$0xff] (%p1173_p3), %v965_v11 }
  0x1c   : > { %313 = vst [vmem:[%s257_s15 + $0x20] sm:$0xff] (%p1173_p3), %v966_v12  ;;  %315 = vst [vmem:[%s257_s15 + $0x28] sm:$0xff] (%p1173_p3), %v967_v13  ;;  %v968_v14 = vld [vmem:[%s899_s14 + $0x68] sm:$0xff] (%p1173_p3)  ;;  %v969_v15 = vld [vmem:[%s899_s14 + $0x78] sm:$0xff] (%p1173_p3) }
  0x1d   : > { %317 = vst [vmem:[%s257_s15 + $0x30] sm:$0xff] %v968_v14  ;;  %319 = vst [vmem:[%s257_s15 + $0x38] sm:$0xff] %v969_v15 }
  0x1e PF: > { %p970_p5 = scmp.ge.s32.totalorder %s1113_s20, 1  ;;  %p324_p6 = scmp.lt.s32.totalorder %s1113_s20, 3 }
  0x20   : > { %p325_p7 = pnand %p970_p5, %p324_p6 }
  0x21   : > { %s331_s16 = sand.u32 (!%p325_p7), 1, %s1105_s18   ;;  %vm393_vm0 = vcmask (!%p325_p7), 64512   ;;  %s973_s29 = sshll.u32 (!%p325_p7), %s951_s21, 3 }
  0x22   : > { %328 = sbr.rel (%p325_p7) target bundleno = 600 (0x258), region = 108  ;;  %s971_s17 = sshll.u32 (!%p325_p7), %s331_s16, 6 }
  0x23   : > { %s1195_s23 = scalar_lea.vmem (!%p325_p7), [#allocation2], %s971_s17  ;;  %s1199_s24 = scalar_lea.vmem (!%p325_p7), [#allocation3], %s971_s17 }
  0x24   : > { %v378_v16 = vld [vmem:[%s1195_s23 + $0x8] sm:$0xff] (!%p325_p7)  ;;  %v377_v17 = vld [vmem:[%s1195_s23] sm:$0xff] (!%p325_p7)  ;;  %v1208_v24 = vld [vmem:[%s1199_s24 + $0x10] sm:$0xff] (!%p325_p7)  ;;  %p372_p8 = scmp.lt.s32.totalorder (!%p325_p7), %s973_s29, 15 }
  0x25   : > { %v386_v18 = vld [vmem:[%s1199_s24 + $0x8] sm:$0xff] (!%p325_p7)  ;;  %v397_v19 = vsel (!%p325_p7), %vm393_vm0, %v378_v16, 0.0  ;;  %v394_v20 = vsel (!%p325_p7), %vm393_vm0, %v377_v17, 0.0  ;;  %v385_v21 = vld [vmem:[%s1199_s24] sm:$0xff] (!%p325_p7)  ;;  %v379_v25 = vld [vmem:[%s1195_s23 + $0x10] sm:$0xff] (!%p325_p7)  ;;  %v424_v26 = vsel (!%p325_p7), %vm393_vm0, %v1208_v24, 0.0 }
  0x26   : > { %398 = vadd.xlane.f32.xlu1 (!%p325_p7), %v397_v19  ;;  %395 = vadd.xlane.f32.xlu0 (!%p325_p7), %v394_v20  ;;  %v421_v22 = vsel (!%p325_p7), %vm393_vm0, %v386_v18, 0.0  ;;  %v418_v23 = vsel (!%p325_p7), %vm393_vm0, %v385_v21, 0.0  ;;  %v400_v27 = vsel (!%p325_p7), %vm393_vm0, %v379_v25, 0.0  ;;  %v1215_v28 = vld [vmem:[%s1199_s24 + $0x18] sm:$0xff] (!%p325_p7)  ;;  %v1225_v32 = vld [vmem:[%s1199_s24 + $0x20] sm:$0xff] (!%p325_p7)  ;;  %v1235_v36 = vld [vmem:[%s1199_s24 + $0x28] sm:$0xff] (!%p325_p7) }
  0x27   : > { %v1218_v29 = vld [vmem:[%s1195_s23 + $0x18] sm:$0xff] (!%p325_p7)  ;;  %v427_v30 = vsel (!%p325_p7), %vm393_vm0, %v1215_v28, 0.0  ;;  %v1228_v33 = vld [vmem:[%s1195_s23 + $0x20] sm:$0xff] (!%p325_p7)  ;;  %v430_v34 = vsel (!%p325_p7), %vm393_vm0, %v1225_v32, 0.0  ;;  %v1238_v37 = vld [vmem:[%s1195_s23 + $0x28] sm:$0xff] (!%p325_p7)  ;;  %v433_v38 = vsel (!%p325_p7), %vm393_vm0, %v1235_v36, 0.0 }
  0x28   : > { %v403_v31 = vsel (!%p325_p7), %vm393_vm0, %v1218_v29, 0.0  ;;  %v406_v35 = vsel (!%p325_p7), %vm393_vm0, %v1228_v33, 0.0  ;;  %v409_v39 = vsel (!%p325_p7), %vm393_vm0, %v1238_v37, 0.0  ;;  %v1245_v40 = vld [vmem:[%s1199_s24 + $0x30] sm:$0xff] (!%p325_p7)  ;;  %v1255_v44 = vld [vmem:[%s1199_s24 + $0x38] sm:$0xff] (!%p325_p7) }
  0x29   : > { %v1248_v41 = vld [vmem:[%s1195_s23 + $0x30] sm:$0xff]  ;;  %v436_v42 = vsel %vm393_vm0, %v1245_v40, 0.0  ;;  %v1258_v45 = vld [vmem:[%s1195_s23 + $0x38] sm:$0xff]  ;;  %v439_v46 = vsel %vm393_vm0, %v1255_v44, 0.0  ;;  %s1440_s29 = smov (!%p372_p8, %s973_s29), 15 }
  0x2a   : > { %422 = vadd.xlane.f32.xlu1 %v421_v22  ;;  %419 = vadd.xlane.f32.xlu0 %v418_v23  ;;  %v412_v43 = vsel %vm393_vm0, %v1248_v41, 0.0  ;;  %v415_v47 = vsel %vm393_vm0, %v1258_v45, 0.0  ;;  %s974_s30 = sshll.u32 %s1440_s29, 3 }
  0x2b   : > { %s1401_s10 = scalar_lea.vmem %s1434_s5, %s974_s30 }
  0x2e   : > { %425 = vadd.xlane.f32.xlu1 %v424_v26  ;;  %401 = vadd.xlane.f32.xlu0 %v400_v27 }
  0x32   : > { %428 = vadd.xlane.f32.xlu1 %v427_v30  ;;  %404 = vadd.xlane.f32.xlu0 %v403_v31 }
  0x36   : > { %431 = vadd.xlane.f32.xlu1 %v430_v34  ;;  %407 = vadd.xlane.f32.xlu0 %v406_v35 }
  0x3a   : > { %434 = vadd.xlane.f32.xlu1 %v433_v38  ;;  %410 = vadd.xlane.f32.xlu0 %v409_v39 }
  0x3e   : > { %437 = vadd.xlane.f32.xlu1 %v436_v42  ;;  %413 = vadd.xlane.f32.xlu0 %v412_v43 }
  0x42   : > { %440 = vadd.xlane.f32.xlu1 %v439_v46  ;;  %416 = vadd.xlane.f32.xlu0 %v415_v47 }
  0xb3   : > { %v399_v48 = vpop.xlane.xlu1 %398  ;;  %v396_v49 = vpop.xlane.xlu0 %395 }
  0xb7   : > { %v423_v50 = vpop.xlane.xlu1 %422  ;;  %v420_v51 = vpop.xlane.xlu0 %419 }
  0xb8   : > { %v443_v52 = vadd.f32 %v423_v50, %v399_v48  ;;  %v442_v53 = vadd.f32 %v420_v51, %v396_v49 }
  0xba   : > { %v451_v54 = vmul.f32 0.0625, %v443_v52  ;;  %v450_v55 = vmul.f32 0.0625, %v442_v53 }
  0xbb   : > { %v426_v56 = vpop.xlane.xlu1 %425  ;;  %v402_v57 = vpop.xlane.xlu0 %401 }
  0xbc   : > { %v1264_v58 = vsub.f32 %v378_v16, %v451_v54  ;;  %v1266_v59 = vsub.f32 %v386_v18, %v451_v54  ;;  %v1268_v60 = vsub.f32 %v377_v17, %v450_v55  ;;  %v1270_v61 = vsub.f32 %v385_v21, %v450_v55 }
  0xbd   : > { %v444_v62 = vadd.f32 %v426_v56, %v402_v57 }
  0xbe   : > { %v506_v63 = vmul.f32 %v1270_v61, %v1270_v61  ;;  %v474_v0 = vmul.f32 %v1268_v60, %v1268_v60  ;;  %v507_v4 = vmul.f32 %v1266_v59, %v1266_v59  ;;  %v475_v8 = vmul.f32 %v1264_v58, %v1264_v58 }
  0xbf   : > { %v452_v1 = vmul.f32 0.0625, %v444_v62  ;;  %v429_v2 = vpop.xlane.xlu1 %428  ;;  %v405_v3 = vpop.xlane.xlu0 %404 }
  0xc0   : > { %v514_v5 = vsel %vm393_vm0, %v506_v63, 0.0  ;;  %v482_v6 = vsel %vm393_vm0, %v474_v0, 0.0  ;;  %v445_v7 = vadd.f32 %v429_v2, %v405_v3  ;;  %v517_v12 = vsel %vm393_vm0, %v507_v4, 0.0 }
  0xc1   : > { %v1282_v9 = vsub.f32 %v379_v25, %v452_v1  ;;  %v1285_v10 = vsub.f32 %v1208_v24, %v452_v1  ;;  %515 = vadd.xlane.f32.xlu1 %v514_v5  ;;  %483 = vadd.xlane.f32.xlu0 %v482_v6  ;;  %v485_v19 = vsel %vm393_vm0, %v475_v8, 0.0  ;;  %v586_v5 = vld [vmem:[%s1431_s2] sm:$0xff] }
  0xc2   : > { %v453_v11 = vmul.f32 0.0625, %v445_v7  ;;  %1029 = vmatprep.subr.mxu0 %v586_v5 }
  0xc3   : > { %v432_v13 = vpop.xlane.xlu1 %431  ;;  %v408_v14 = vpop.xlane.xlu0 %407  ;;  %v508_v15 = vmul.f32 %v1285_v10, %v1285_v10  ;;  %v476_v16 = vmul.f32 %v1282_v9, %v1282_v9  ;;  %1030 = vmatpush3.msra.mxu0 %v586_v5 }
  0xc4   : > { %v1293_v17 = vsub.f32 %v1218_v29, %v453_v11  ;;  %v1296_v18 = vsub.f32 %v1215_v28, %v453_v11  ;;  %v446_v20 = vadd.f32 %v432_v13, %v408_v14 }
  0xc5   : > { %518 = vadd.xlane.f32.xlu1 %v517_v12  ;;  %486 = vadd.xlane.f32.xlu0 %v485_v19  ;;  %v520_v21 = vsel %vm393_vm0, %v508_v15, 0.0  ;;  %v488_v23 = vsel %vm393_vm0, %v476_v16, 0.0 }
  0xc6   : > { %v454_v22 = vmul.f32 0.0625, %v446_v20  ;;  %v509_v24 = vmul.f32 %v1296_v18, %v1296_v18  ;;  %v477_v25 = vmul.f32 %v1293_v17, %v1293_v17 }
  0xc7   : > { %v435_v26 = vpop.xlane.xlu1 %434  ;;  %v411_v27 = vpop.xlane.xlu0 %410 }
  0xc8   : > { %v1306_v28 = vsub.f32 %v1228_v33, %v454_v22  ;;  %v1309_v29 = vsub.f32 %v1225_v32, %v454_v22  ;;  %v447_v30 = vadd.f32 %v435_v26, %v411_v27  ;;  %v523_v31 = vsel %vm393_vm0, %v509_v24, 0.0 }
  0xc9   : > { %521 = vadd.xlane.f32.xlu1 %v520_v21  ;;  %489 = vadd.xlane.f32.xlu0 %v488_v23  ;;  %v491_v35 = vsel %vm393_vm0, %v477_v25, 0.0 }
  0xca   : > { %v455_v34 = vmul.f32 0.0625, %v447_v30  ;;  %v510_v38 = vmul.f32 %v1309_v29, %v1309_v29  ;;  %v478_v39 = vmul.f32 %v1306_v28, %v1306_v28 }
  0xcb   : > { %v438_v42 = vpop.xlane.xlu1 %437  ;;  %v414_v33 = vpop.xlane.xlu0 %413 }
  0xcc   : > { %v1318_v43 = vsub.f32 %v1238_v37, %v455_v34  ;;  %v1321_v32 = vsub.f32 %v1235_v36, %v455_v34  ;;  %v448_v46 = vadd.f32 %v438_v42, %v414_v33  ;;  %v526_v47 = vsel %vm393_vm0, %v510_v38, 0.0 }
  0xcd   : > { %524 = vadd.xlane.f32.xlu1 %v523_v31  ;;  %492 = vadd.xlane.f32.xlu0 %v491_v35  ;;  %v494_v49 = vsel %vm393_vm0, %v478_v39, 0.0 }
  0xce   : > { %v456_v48 = vmul.f32 0.0625, %v448_v46  ;;  %v511_v50 = vmul.f32 %v1321_v32, %v1321_v32  ;;  %v479_v51 = vmul.f32 %v1318_v43, %v1318_v43 }
  0xcf   : > { %v441_v52 = vpop.xlane.xlu1 %440  ;;  %v417_v37 = vpop.xlane.xlu0 %416 }
  0xd0   : > { %v1330_v53 = vsub.f32 %v1248_v41, %v456_v48  ;;  %v1333_v36 = vsub.f32 %v1245_v40, %v456_v48  ;;  %v449_v54 = vadd.f32 %v441_v52, %v417_v37  ;;  %v529_v55 = vsel %vm393_vm0, %v511_v50, 0.0 }
  0xd1   : > { %527 = vadd.xlane.f32.xlu1 %v526_v47  ;;  %495 = vadd.xlane.f32.xlu0 %v494_v49  ;;  %v497_v57 = vsel %vm393_vm0, %v479_v51, 0.0 }
  0xd2   : > { %v457_v56 = vmul.f32 0.0625, %v449_v54  ;;  %v512_v62 = vmul.f32 %v1333_v36, %v1333_v36  ;;  %v480_v63 = vmul.f32 %v1330_v53, %v1330_v53 }
  0xd4   : > { %v1342_v41 = vsub.f32 %v1258_v45, %v457_v56  ;;  %v1345_v40 = vsub.f32 %v1255_v44, %v457_v56  ;;  %v532_v0 = vsel %vm393_vm0, %v512_v62, 0.0  ;;  %v500_v1 = vsel %vm393_vm0, %v480_v63, 0.0  ;;  %v587_v44 = vld [vmem:[%s1432_s3] sm:$0xff] }
  0xd5   : > { %530 = vadd.xlane.f32.xlu1 %v529_v55  ;;  %498 = vadd.xlane.f32.xlu0 %v497_v57 }
  0xd6   : > { %v513_v2 = vmul.f32 %v1345_v40, %v1345_v40  ;;  %v481_v3 = vmul.f32 %v1342_v41, %v1342_v41  ;;  %1015 = vmatprep.subr.mxu1 %v587_v44 }
  0xd7   : > { %1016 = vmatpush3.msra.mxu1 %v587_v44 }
  0xd8   : > { %v535_v45 = vsel %vm393_vm0, %v513_v2, 0.0  ;;  %v503_v4 = vsel %vm393_vm0, %v481_v3, 0.0 }
  0xd9   : > { %533 = vadd.xlane.f32.xlu1 %v532_v0  ;;  %501 = vadd.xlane.f32.xlu0 %v500_v1 }
  0xdd   : > { %536 = vadd.xlane.f32.xlu1 %v535_v45  ;;  %504 = vadd.xlane.f32.xlu0 %v503_v4 }
 0x14e   : > { %v516_v6 = vpop.xlane.xlu1 %515  ;;  %v484_v7 = vpop.xlane.xlu0 %483 }
 0x14f   : > { %v538_v8 = vadd.f32 %v516_v6, %v484_v7 }
 0x151   : > { %v546_v11 = vmul.f32 0.0625, %v538_v8 }
 0x152   : > { %v519_v12 = vpop.xlane.xlu1 %518  ;;  %v487_v13 = vpop.xlane.xlu0 %486 }
 0x153   : > { %v554_v14 = vadd.f32 1e-05, %v546_v11  ;;  %v539_v15 = vadd.f32 %v519_v12, %v487_v13 }
 0x155   : > { %1075 = vrsqrt.f32 %v554_v14  ;;  %v547_v16 = vmul.f32 0.0625, %v539_v15 }
 0x156   : > { %v522_v19 = vpop.xlane.xlu1 %521  ;;  %v490_v20 = vpop.xlane.xlu0 %489 }
 0x157   : > { %v555_v21 = vadd.f32 1e-05, %v547_v16  ;;  %v540_v22 = vadd.f32 %v522_v19, %v490_v20 }
 0x159   : > { %1077 = vrsqrt.f32 %v555_v21  ;;  %v548_v23 = vmul.f32 0.0625, %v540_v22 }
 0x15a   : > { %v525_v24 = vpop.xlane.xlu1 %524  ;;  %v493_v25 = vpop.xlane.xlu0 %492 }
 0x15b   : > { %v556_v26 = vadd.f32 1e-05, %v548_v23  ;;  %v541_v27 = vadd.f32 %v525_v24, %v493_v25 }
 0x15d   : > { %1079 = vrsqrt.f32 %v556_v26  ;;  %v549_v30 = vmul.f32 0.0625, %v541_v27 }
 0x15e   : > { %v528_v31 = vpop.xlane.xlu1 %527  ;;  %v496_v34 = vpop.xlane.xlu0 %495 }
 0x15f   : > { %v1076_v35 = vpop.eup %1075  ;;  %v557_v38 = vadd.f32 1e-05, %v549_v30  ;;  %v542_v39 = vadd.f32 %v528_v31, %v496_v34 }
 0x160   : > { %v578_v42 = vmul.f32 %v1076_v35, %v1270_v61  ;;  %v570_v33 = vmul.f32 %v1076_v35, %v1268_v60 }
 0x161   : > { %1081 = vrsqrt.f32 %v557_v38  ;;  %v550_v46 = vmul.f32 0.0625, %v542_v39 }
 0x162   : > { %v531_v47 = vpop.xlane.xlu1 %530  ;;  %1017 = vmatprep.mubr.msk.f32.mxu1 %vm393_vm0, %v578_v42  ;;  %1031 = vmatprep.mubr.msk.f32.mxu0 %vm393_vm0, %v570_v33  ;;  %v499_v48 = vpop.xlane.xlu0 %498 }
 0x163   : > { %v1078_v49 = vpop.eup %1077  ;;  %v558_v50 = vadd.f32 1e-05, %v550_v46  ;;  %v543_v51 = vadd.f32 %v531_v47, %v499_v48 }
 0x164   : > { %v579_v52 = vmul.f32 %v1078_v49, %v1266_v59  ;;  %v571_v37 = vmul.f32 %v1078_v49, %v1264_v58 }
 0x165   : > { %1083 = vrsqrt.f32 %v558_v50  ;;  %v551_v54 = vmul.f32 0.0625, %v543_v51 }
 0x166   : > { %v534_v61 = vpop.xlane.xlu1 %533  ;;  %1018 = vmatmul.mubr.msk.f32.vlgmr.msra.gmra.mrb[0].mxu1 %vm393_vm0, %v579_v52  ;;  %1032 = vmatmul.mubr.msk.f32.vlgmr.msra.gmra.mrb[0].mxu0 %vm393_vm0, %v571_v37  ;;  %v502_v60 = vpop.xlane.xlu0 %501 }
 0x167   : > { %v1080_v55 = vpop.eup %1079  ;;  %v559_v56 = vadd.f32 1e-05, %v551_v54  ;;  %v544_v57 = vadd.f32 %v534_v61, %v502_v60 }
 0x168   : > { %v580_v62 = vmul.f32 %v1080_v55, %v1285_v10  ;;  %v572_v63 = vmul.f32 %v1080_v55, %v1282_v9 }
 0x169   : > { %1085 = vrsqrt.f32 %v559_v56  ;;  %v552_v0 = vmul.f32 0.0625, %v544_v57 }
 0x16a   : > { %v537_v59 = vpop.xlane.xlu1 %536  ;;  %1020 = vmatprep.mubr.msk.f32.mxu1 %vm393_vm0, %v580_v62  ;;  %1034 = vmatprep.mubr.msk.f32.mxu0 %vm393_vm0, %v572_v63  ;;  %v505_v58 = vpop.xlane.xlu0 %504 }
 0x16b   : > { %v1082_v1 = vpop.eup %1081  ;;  %v560_v2 = vadd.f32 1e-05, %v552_v0  ;;  %v545_v3 = vadd.f32 %v537_v59, %v505_v58 }
 0x16c   : > { %v581_v45 = vmul.f32 %v1082_v1, %v1296_v18  ;;  %v573_v4 = vmul.f32 %v1082_v1, %v1293_v17 }
 0x16d   : > { %1087 = vrsqrt.f32 %v560_v2  ;;  %v553_v44 = vmul.f32 0.0625, %v545_v3 }
 0x16e   : > { %1021 = vmatmul.mubr.msk.f32.gmra.mrb[2].mxu1 %vm393_vm0, %v581_v45  ;;  %1035 = vmatmul.mubr.msk.f32.gmra.mrb[2].mxu0 %vm393_vm0, %v573_v4 }
 0x16f   : > { %v1084_v9 = vpop.eup %1083  ;;  %v561_v10 = vadd.f32 1e-05, %v553_v44 }
 0x170   : > { %v582_v5 = vmul.f32 %v1084_v9, %v1309_v29  ;;  %v574_v6 = vmul.f32 %v1084_v9, %v1306_v28 }
 0x171   : > { %1089 = vrsqrt.f32 %v561_v10 }
 0x172   : > { %1023 = vmatprep.mubr.msk.f32.mxu1 %vm393_vm0, %v582_v5  ;;  %1037 = vmatprep.mubr.msk.f32.mxu0 %vm393_vm0, %v574_v6 }
 0x173   : > { %v1086_v18 = vpop.eup %1085 }
 0x174   : > { %v583_v17 = vmul.f32 %v1086_v18, %v1321_v32  ;;  %v575_v7 = vmul.f32 %v1086_v18, %v1318_v43 }
 0x176   : > { %1024 = vmatmul.mubr.msk.f32.gmra.mrb[4].mxu1 %vm393_vm0, %v583_v17  ;;  %1038 = vmatmul.mubr.msk.f32.gmra.mrb[4].mxu0 %vm393_vm0, %v575_v7 }
 0x177   : > { %v1088_v8 = vpop.eup %1087 }
 0x178   : > { %v584_v29 = vmul.f32 %v1088_v8, %v1333_v36  ;;  %v576_v28 = vmul.f32 %v1088_v8, %v1330_v53  ;;  %v991_v36 = vld [vmem:[%s1433_s4] ss:$0 sm:$0xff] }
 0x17a   : > { %1026 = vmatprep.mubr.msk.f32.mxu1 %vm393_vm0, %v584_v29  ;;  %1040 = vmatprep.mubr.msk.f32.mxu0 %vm393_vm0, %v576_v28 }
 0x17b   : > { %v1090_v11 = vpop.eup %1089 }
 0x17c   : > { %v585_v12 = vmul.f32 %v1090_v11, %v1345_v40  ;;  %v577_v32 = vmul.f32 %v1090_v11, %v1342_v41 }
 0x17e   : > { %1027 = vmatmul.mubr.msk.f32.gmra.mrb[6].mxu1 %vm393_vm0, %v585_v12  ;;  %1041 = vmatmul.mubr.msk.f32.gmra.mrb[6].mxu0 %vm393_vm0, %v577_v32 }
 0x239   : > { %v1019_v43 = vpop.f32.mrb[0].mxu1  ;;  %v1033_v53 = vpop.f32.mrb[0].mxu0 }
 0x23a   : > { %v813_v13 = vadd.f32 %v1033_v53, %v1019_v43  ;;  %v678_v14 = vpop.f32.mrb[1].mxu1  ;;  %v807_v40 = vpop.f32.mrb[1].mxu0 }
 0x23b   : > { %v808_v41 = vadd.f32 %v807_v40, %v678_v14 }
 0x23c   : > { %v854_v15 = vadd.f32 %v991_v36, %v813_v13 }
 0x23d   : > { %v853_v16 = vadd.f32 %v991_v36, %v808_v41 }
 0x23e   : > { %862 = vst.msk [vmem:[%s1401_s10 + $0x8] sm:$0xff] %vm393_vm0, %v854_v15 }
 0x23f   : > { %861 = vst.msk [vmem:[%s1401_s10] sm:$0xff] %vm393_vm0, %v853_v16 }
 0x241   : > { %v1022_v19 = vpop.f32.mrb[2].mxu1  ;;  %v1036_v20 = vpop.f32.mrb[2].mxu0 }
 0x242   : > { %v823_v21 = vadd.f32 %v1036_v20, %v1022_v19  ;;  %v688_v22 = vpop.f32.mrb[3].mxu1  ;;  %v817_v23 = vpop.f32.mrb[3].mxu0 }
 0x243   : > { %v818_v24 = vadd.f32 %v817_v23, %v688_v22 }
 0x244   : > { %v856_v25 = vadd.f32 %v991_v36, %v823_v21 }
 0x245   : > { %v855_v26 = vadd.f32 %v991_v36, %v818_v24 }
 0x246   : > { %864 = vst.msk [vmem:[%s1401_s10 + $0x18] sm:$0xff] %vm393_vm0, %v856_v25 }
 0x247   : > { %863 = vst.msk [vmem:[%s1401_s10 + $0x10] sm:$0xff] %vm393_vm0, %v855_v26 }
 0x249   : > { %v1025_v27 = vpop.f32.mrb[4].mxu1  ;;  %v1039_v30 = vpop.f32.mrb[4].mxu0 }
 0x24a   : > { %v833_v31 = vadd.f32 %v1039_v30, %v1025_v27  ;;  %v698_v34 = vpop.f32.mrb[5].mxu1  ;;  %v827_v35 = vpop.f32.mrb[5].mxu0 }
 0x24b   : > { %v828_v38 = vadd.f32 %v827_v35, %v698_v34 }
 0x24c   : > { %v858_v39 = vadd.f32 %v991_v36, %v833_v31 }
 0x24d   : > { %v857_v42 = vadd.f32 %v991_v36, %v828_v38 }
 0x24e   : > { %866 = vst.msk [vmem:[%s1401_s10 + $0x28] sm:$0xff] %vm393_vm0, %v858_v39 }
 0x24f   : > { %865 = vst.msk [vmem:[%s1401_s10 + $0x20] sm:$0xff] %vm393_vm0, %v857_v42 }
 0x251   : > { %v1028_v33 = vpop.f32.mrb[6].mxu1  ;;  %v1042_v46 = vpop.f32.mrb[6].mxu0 }
 0x252   : > { %v843_v47 = vadd.f32 %v1042_v46, %v1028_v33  ;;  %v708_v48 = vpop.f32.mrb[7].mxu1  ;;  %v837_v49 = vpop.f32.mrb[7].mxu0 }
 0x253   : > { %v838_v50 = vadd.f32 %v837_v49, %v708_v48 }
 0x254   : > { %v860_v51 = vadd.f32 %v991_v36, %v843_v47 }
 0x255   : > { %v859_v52 = vadd.f32 %v991_v36, %v838_v50 }
 0x256   : > { %868 = vst.msk [vmem:[%s1401_s10 + $0x38] sm:$0xff] %vm393_vm0, %v860_v51 }
 0x257   : > { %867 = vst.msk [vmem:[%s1401_s10 + $0x30] sm:$0xff] %vm393_vm0, %v859_v52 }
 0x258 PF: > { %p12_p9 = scmp.ge.s32.totalorder %s1162_s22, 4   ;;  %s1436_s18 = smov %s1109_s19 }
 0x259   : > { %s1437_s19 = smov %s1171_s25  ;;  %s1438_s20 = smov %s1162_s22 }
 0x25a   :  { %14 = sbr.rel (!%p12_p9) target bundleno = 2 (0x2), region = 159 }

// kernel: tpu_custom_call.1
= control target key start
LH: loop header
LB: loop body
LE: loop exit
PB: predicated region body
PF: predicated region fallthrough
CT: control target
= control target key end

     0   :  { %vm30_vm0 = vcmask 130048   ;;  %vm442_vm1 = vcmask 64512   ;;  %s873_s0 = inlined_call_operand.vmem [shape: f32[128,16], index: 0, kind: input, shape index: {}]   ;;  %s874_s1 = inlined_call_operand.vmem [shape: f32[16,8], index: 1, kind: input, shape index: {}]   ;;  %s875_s2 = inlined_call_operand.vmem [shape: f32[1,8], index: 2, kind: input, shape index: {}]   ;;  %s876_s3 = inlined_call_operand.vmem [shape: f32[128,8], index: 3, kind: output, shape index: {}]  }
   0x1   :  { %v14_v0 = vld [vmem:[%s873_s0] sm:$0xff]  ;;  %v15_v1 = vld [vmem:[%s873_s0 + $0x8] sm:$0xff]  ;;  %v16_v8 = vld [vmem:[%s873_s0 + $0x10] sm:$0xff] }
   0x2   :  { %v22_v2 = vld [vmem:[%s873_s0 + $0x40] sm:$0xff]  ;;  %v31_v3 = vsel %vm30_vm0, %v14_v0, 0.0  ;;  %v34_v4 = vsel %vm30_vm0, %v15_v1, 0.0  ;;  %v23_v5 = vld [vmem:[%s873_s0 + $0x48] sm:$0xff]  ;;  %v24_v9 = vld [vmem:[%s873_s0 + $0x50] sm:$0xff]  ;;  %v37_v10 = vsel %vm30_vm0, %v16_v8, 0.0 }
   0x3   :  { %32 = vadd.xlane.f32.xlu0 %v31_v3  ;;  %35 = vadd.xlane.f32.xlu1 %v34_v4  ;;  %v55_v6 = vsel %vm30_vm0, %v22_v2, 0.0  ;;  %v58_v7 = vsel %vm30_vm0, %v23_v5, 0.0  ;;  %v61_v11 = vsel %vm30_vm0, %v24_v9, 0.0  ;;  %v611_v12 = vld [vmem:[%s873_s0 + $0x18] sm:$0xff]  ;;  %v625_v16 = vld [vmem:[%s873_s0 + $0x20] sm:$0xff]  ;;  %v639_v20 = vld [vmem:[%s873_s0 + $0x28] sm:$0xff] }
   0x4   :  { %v616_v13 = vld [vmem:[%s873_s0 + $0x58] sm:$0xff]  ;;  %v40_v14 = vsel %vm30_vm0, %v611_v12, 0.0  ;;  %v630_v17 = vld [vmem:[%s873_s0 + $0x60] sm:$0xff]  ;;  %v43_v18 = vsel %vm30_vm0, %v625_v16, 0.0  ;;  %v644_v21 = vld [vmem:[%s873_s0 + $0x68] sm:$0xff]  ;;  %v46_v22 = vsel %vm30_vm0, %v639_v20, 0.0 }
   0x5   :  { %v64_v15 = vsel %vm30_vm0, %v616_v13, 0.0  ;;  %v67_v19 = vsel %vm30_vm0, %v630_v17, 0.0  ;;  %v70_v23 = vsel %vm30_vm0, %v644_v21, 0.0  ;;  %v653_v24 = vld [vmem:[%s873_s0 + $0x30] sm:$0xff]  ;;  %v667_v28 = vld [vmem:[%s873_s0 + $0x38] sm:$0xff] }
   0x6   :  { %v658_v25 = vld [vmem:[%s873_s0 + $0x70] sm:$0xff]  ;;  %v49_v26 = vsel %vm30_vm0, %v653_v24, 0.0  ;;  %v672_v29 = vld [vmem:[%s873_s0 + $0x78] sm:$0xff]  ;;  %v52_v30 = vsel %vm30_vm0, %v667_v28, 0.0 }
   0x7   :  { %56 = vadd.xlane.f32.xlu0 %v55_v6  ;;  %59 = vadd.xlane.f32.xlu1 %v58_v7  ;;  %v73_v27 = vsel %vm30_vm0, %v658_v25, 0.0  ;;  %v76_v31 = vsel %vm30_vm0, %v672_v29, 0.0 }
   0xb   :  { %38 = vadd.xlane.f32.xlu0 %v37_v10  ;;  %62 = vadd.xlane.f32.xlu1 %v61_v11 }
   0xf   :  { %41 = vadd.xlane.f32.xlu0 %v40_v14  ;;  %65 = vadd.xlane.f32.xlu1 %v64_v15 }
  0x13   :  { %44 = vadd.xlane.f32.xlu0 %v43_v18  ;;  %68 = vadd.xlane.f32.xlu1 %v67_v19 }
  0x17   :  { %47 = vadd.xlane.f32.xlu0 %v46_v22  ;;  %71 = vadd.xlane.f32.xlu1 %v70_v23 }
  0x1b   :  { %50 = vadd.xlane.f32.xlu0 %v49_v26  ;;  %74 = vadd.xlane.f32.xlu1 %v73_v27 }
  0x1f   :  { %53 = vadd.xlane.f32.xlu0 %v52_v30  ;;  %77 = vadd.xlane.f32.xlu1 %v76_v31 }
  0x90   :  { %v33_v32 = vpop.xlane.xlu0 %32  ;;  %v36_v33 = vpop.xlane.xlu1 %35 }
  0x91   :  { %v80_v34 = vmul.f32 0.0625, %v33_v32  ;;  %v81_v35 = vmul.f32 0.0625, %v36_v33 }
  0x93   :  { %v678_v36 = vsub.f32 %v14_v0, %v80_v34  ;;  %v680_v37 = vsub.f32 %v15_v1, %v81_v35 }
  0x94   :  { %v57_v38 = vpop.xlane.xlu0 %56  ;;  %v60_v39 = vpop.xlane.xlu1 %59 }
  0x95   :  { %v88_v40 = vmul.f32 0.0625, %v57_v38  ;;  %v89_v41 = vmul.f32 0.0625, %v60_v39  ;;  %v112_v42 = vmul.f32 %v678_v36, %v678_v36  ;;  %v113_v43 = vmul.f32 %v680_v37, %v680_v37 }
  0x97   :  { %v686_v44 = vsub.f32 %v22_v2, %v88_v40  ;;  %v688_v45 = vsub.f32 %v23_v5, %v89_v41  ;;  %v128_v46 = vsel %vm30_vm0, %v112_v42, 0.0  ;;  %v131_v49 = vsel %vm30_vm0, %v113_v43, 0.0 }
  0x98   :  { %129 = vadd.xlane.f32.xlu0 %v128_v46  ;;  %v39_v47 = vpop.xlane.xlu0 %38  ;;  %v63_v48 = vpop.xlane.xlu1 %62 }
  0x99   :  { %v82_v50 = vmul.f32 0.0625, %v39_v47  ;;  %v90_v51 = vmul.f32 0.0625, %v63_v48  ;;  %v120_v52 = vmul.f32 %v686_v44, %v686_v44  ;;  %v121_v53 = vmul.f32 %v688_v45, %v688_v45 }
  0x9b   :  { %v696_v54 = vsub.f32 %v16_v8, %v82_v50  ;;  %v698_v55 = vsub.f32 %v24_v9, %v90_v51  ;;  %v152_v56 = vsel %vm30_vm0, %v120_v52, 0.0  ;;  %v155_v59 = vsel %vm30_vm0, %v121_v53, 0.0  ;;  %v241_v53 = vld [vmem:[%s874_s1 + $0x8] sm:$0xff] }
  0x9c   :  { %132 = vadd.xlane.f32.xlu0 %v131_v49  ;;  %153 = vadd.xlane.f32.xlu1 %v152_v56  ;;  %v42_v57 = vpop.xlane.xlu0 %41  ;;  %v66_v58 = vpop.xlane.xlu1 %65 }
  0x9d   :  { %v83_v60 = vmul.f32 0.0625, %v42_v57  ;;  %v91_v61 = vmul.f32 0.0625, %v66_v58  ;;  %v114_v62 = vmul.f32 %v696_v54, %v696_v54  ;;  %v122_v63 = vmul.f32 %v698_v55, %v698_v55 }
  0x9f   :  { %v707_v0 = vsub.f32 %v611_v12, %v83_v60  ;;  %v710_v1 = vsub.f32 %v616_v13, %v91_v61  ;;  %v134_v2 = vsel %vm30_vm0, %v114_v62, 0.0  ;;  %v158_v5 = vsel %vm30_vm0, %v122_v63, 0.0 }
  0xa0   :  { %156 = vadd.xlane.f32.xlu1 %v155_v59  ;;  %135 = vadd.xlane.f32.xlu0 %v134_v2  ;;  %v45_v3 = vpop.xlane.xlu0 %44  ;;  %v69_v4 = vpop.xlane.xlu1 %68 }
  0xa1   :  { %v84_v6 = vmul.f32 0.0625, %v45_v3  ;;  %v92_v7 = vmul.f32 0.0625, %v69_v4  ;;  %v115_v8 = vmul.f32 %v707_v0, %v707_v0  ;;  %v123_v9 = vmul.f32 %v710_v1, %v710_v1 }
  0xa3   :  { %v719_v10 = vsub.f32 %v625_v16, %v84_v6  ;;  %v722_v11 = vsub.f32 %v630_v17, %v92_v7  ;;  %v137_v12 = vsel %vm30_vm0, %v115_v8, 0.0  ;;  %v161_v15 = vsel %vm30_vm0, %v123_v9, 0.0 }
  0xa4   :  { %159 = vadd.xlane.f32.xlu1 %v158_v5  ;;  %138 = vadd.xlane.f32.xlu0 %v137_v12  ;;  %v48_v13 = vpop.xlane.xlu0 %47  ;;  %v72_v14 = vpop.xlane.xlu1 %71 }
  0xa5   :  { %v85_v18 = vmul.f32 0.0625, %v48_v13  ;;  %v93_v19 = vmul.f32 0.0625, %v72_v14  ;;  %v116_v22 = vmul.f32 %v719_v10, %v719_v10  ;;  %v124_v16 = vmul.f32 %v722_v11, %v722_v11 }
  0xa7   :  { %v731_v23 = vsub.f32 %v639_v20, %v85_v18  ;;  %v734_v17 = vsub.f32 %v644_v21, %v93_v19  ;;  %v140_v26 = vsel %vm30_vm0, %v116_v22, 0.0  ;;  %v164_v31 = vsel %vm30_vm0, %v124_v16, 0.0 }
  0xa8   :  { %162 = vadd.xlane.f32.xlu1 %v161_v15  ;;  %141 = vadd.xlane.f32.xlu0 %v140_v26  ;;  %v51_v27 = vpop.xlane.xlu0 %50  ;;  %v75_v30 = vpop.xlane.xlu1 %74 }
  0xa9   :  { %v86_v32 = vmul.f32 0.0625, %v51_v27  ;;  %v94_v33 = vmul.f32 0.0625, %v75_v30  ;;  %v117_v34 = vmul.f32 %v731_v23, %v731_v23  ;;  %v125_v20 = vmul.f32 %v734_v17, %v734_v17 }
  0xab   :  { %v743_v35 = vsub.f32 %v653_v24, %v86_v32  ;;  %v746_v21 = vsub.f32 %v658_v25, %v94_v33  ;;  %v143_v38 = vsel %vm30_vm0, %v117_v34, 0.0  ;;  %v167_v41 = vsel %vm30_vm0, %v125_v20, 0.0 }
  0xac   :  { %165 = vadd.xlane.f32.xlu1 %v164_v31  ;;  %144 = vadd.xlane.f32.xlu0 %v143_v38  ;;  %v54_v39 = vpop.xlane.xlu0 %53  ;;  %v78_v40 = vpop.xlane.xlu1 %77 }
  0xad   :  { %v87_v42 = vmul.f32 0.0625, %v54_v39  ;;  %v95_v43 = vmul.f32 0.0625, %v78_v40  ;;  %v118_v46 = vmul.f32 %v743_v35, %v743_v35  ;;  %v126_v24 = vmul.f32 %v746_v21, %v746_v21 }
  0xaf   :  { %v755_v47 = vsub.f32 %v667_v28, %v87_v42  ;;  %v758_v25 = vsub.f32 %v672_v29, %v95_v43  ;;  %v146_v48 = vsel %vm30_vm0, %v118_v46, 0.0  ;;  %v170_v49 = vsel %vm30_vm0, %v126_v24, 0.0  ;;  %v240_v29 = vld [vmem:[%s874_s1] sm:$0xff] }
  0xb0   :  { %168 = vadd.xlane.f32.xlu1 %v167_v41  ;;  %147 = vadd.xlane.f32.xlu0 %v146_v48  ;;  %v526_v56 = vpack.c.bf16 %v241_v53, %v240_v29 }
  0xb1   :  { %v119_v50 = vmul.f32 %v755_v47, %v755_v47  ;;  %v127_v51 = vmul.f32 %v758_v25, %v758_v25 }
  0xb2   :  { %527 = vmatprep.subr.bf16.mxu0 %v526_v56  ;;  %530 = vmatprep.subr.bf16.mxu1 %v526_v56 }
  0xb3   :  { %v149_v52 = vsel %vm30_vm0, %v119_v50, 0.0  ;;  %v173_v28 = vsel %vm30_vm0, %v127_v51, 0.0  ;;  %529 = vmatpush3.bf16.msra.mxu0 %v526_v56  ;;  %531 = vmatpush3.bf16.msra.mxu1 %v526_v56 }
  0xb4   :  { %171 = vadd.xlane.f32.xlu1 %v170_v49  ;;  %150 = vadd.xlane.f32.xlu0 %v149_v52 }
  0xb8   :  { %174 = vadd.xlane.f32.xlu1 %v173_v28 }
 0x125   :  { %v130_v57 = vpop.xlane.xlu0 %129 }
 0x126   :  { %v176_v58 = vmul.f32 0.0625, %v130_v57 }
 0x128   :  { %v192_v59 = vadd.f32 1e-05, %v176_v58 }
 0x129   :  { %v154_v60 = vpop.xlane.xlu1 %153  ;;  %v133_v61 = vpop.xlane.xlu0 %132 }
 0x12a   :  { %532 = vrsqrt.f32 %v192_v59  ;;  %v184_v62 = vmul.f32 0.0625, %v154_v60  ;;  %v177_v63 = vmul.f32 0.0625, %v133_v61 }
 0x12c   :  { %v200_v2 = vadd.f32 1e-05, %v184_v62  ;;  %v193_v3 = vadd.f32 1e-05, %v177_v63 }
 0x12d   :  { %v157_v4 = vpop.xlane.xlu1 %156  ;;  %v136_v5 = vpop.xlane.xlu0 %135 }
 0x12e   :  { %534 = vrsqrt.f32 %v200_v2  ;;  %v185_v6 = vmul.f32 0.0625, %v157_v4  ;;  %v178_v7 = vmul.f32 0.0625, %v136_v5 }
 0x12f   :  { %536 = vrsqrt.f32 %v193_v3 }
 0x130   :  { %v201_v8 = vadd.f32 1e-05, %v185_v6  ;;  %v194_v9 = vadd.f32 1e-05, %v178_v7 }
 0x131   :  { %v160_v12 = vpop.xlane.xlu1 %159  ;;  %v139_v13 = vpop.xlane.xlu0 %138 }
 0x132   :  { %538 = vrsqrt.f32 %v201_v8  ;;  %v186_v14 = vmul.f32 0.0625, %v160_v12  ;;  %v179_v15 = vmul.f32 0.0625, %v139_v13 }
 0x133   :  { %540 = vrsqrt.f32 %v194_v9 }
 0x134   :  { %v533_v18 = vpop.eup %532  ;;  %v202_v19 = vadd.f32 1e-05, %v186_v14  ;;  %v195_v22 = vadd.f32 1e-05, %v179_v15 }
 0x135   :  { %v163_v16 = vpop.xlane.xlu1 %162  ;;  %v142_v26 = vpop.xlane.xlu0 %141  ;;  %v224_v27 = vmul.f32 %v533_v18, %v678_v36 }
 0x136   :  { %542 = vrsqrt.f32 %v202_v19  ;;  %v187_v30 = vmul.f32 0.0625, %v163_v16  ;;  %v180_v31 = vmul.f32 0.0625, %v142_v26 }
 0x137   :  { %544 = vrsqrt.f32 %v195_v22  ;;  %502 = vmatprep.mubr.msk.f32.mxu0 %vm30_vm0, %v224_v27 }
 0x138   :  { %v535_v32 = vpop.eup %534  ;;  %v203_v33 = vadd.f32 1e-05, %v187_v30  ;;  %v196_v34 = vadd.f32 1e-05, %v180_v31 }
 0x139   :  { %v537_v20 = vpop.eup %536  ;;  %v166_v38 = vpop.xlane.xlu1 %165  ;;  %v232_v40 = vmul.f32 %v535_v32, %v686_v44 }
 0x13a   :  { %v145_v39 = vpop.xlane.xlu0 %144  ;;  %546 = vrsqrt.f32 %v203_v33  ;;  %v188_v41 = vmul.f32 0.0625, %v166_v38  ;;  %v225_v43 = vmul.f32 %v537_v20, %v680_v37 }
 0x13b   :  { %v181_v42 = vmul.f32 0.0625, %v145_v39  ;;  %548 = vrsqrt.f32 %v196_v34  ;;  %514 = vmatprep.mubr.msk.f32.mxu1 %vm30_vm0, %v232_v40 }
 0x13c   :  { %v539_v36 = vpop.eup %538  ;;  %v204_v46 = vadd.f32 1e-05, %v188_v41  ;;  %503 = vmatmul.mubr.msk.f32.vlgmr.msra.gmra.mrb[0].mxu0 %vm30_vm0, %v225_v43 }
 0x13d   :  { %v197_v24 = vadd.f32 1e-05, %v181_v42  ;;  %v541_v48 = vpop.eup %540  ;;  %v169_v49 = vpop.xlane.xlu1 %168  ;;  %v233_v51 = vmul.f32 %v539_v36, %v688_v45 }
 0x13e   :  { %v148_v50 = vpop.xlane.xlu0 %147  ;;  %550 = vrsqrt.f32 %v204_v46  ;;  %v189_v44 = vmul.f32 0.0625, %v169_v49  ;;  %v226_v28 = vmul.f32 %v541_v48, %v696_v54 }
 0x13f   :  { %v182_v52 = vmul.f32 0.0625, %v148_v50  ;;  %552 = vrsqrt.f32 %v197_v24  ;;  %515 = vmatmul.mubr.msk.f32.vlgmr.msra.gmra.mrb[0].mxu1 %vm30_vm0, %v233_v51 }
 0x140   :  { %v543_v37 = vpop.eup %542  ;;  %v205_v29 = vadd.f32 1e-05, %v189_v44  ;;  %505 = vmatprep.mubr.msk.f32.mxu0 %vm30_vm0, %v226_v28 }
 0x141   :  { %v198_v53 = vadd.f32 1e-05, %v182_v52  ;;  %v545_v56 = vpop.eup %544  ;;  %v172_v57 = vpop.xlane.xlu1 %171  ;;  %v234_v59 = vmul.f32 %v543_v37, %v698_v55 }
 0x142   :  { %v151_v58 = vpop.xlane.xlu0 %150  ;;  %554 = vrsqrt.f32 %v205_v29  ;;  %v190_v45 = vmul.f32 0.0625, %v172_v57  ;;  %v227_v61 = vmul.f32 %v545_v56, %v707_v0 }
 0x143   :  { %v183_v60 = vmul.f32 0.0625, %v151_v58  ;;  %556 = vrsqrt.f32 %v198_v53  ;;  %517 = vmatprep.mubr.msk.f32.mxu1 %vm30_vm0, %v234_v59 }
 0x144   :  { %v547_v54 = vpop.eup %546  ;;  %v206_v62 = vadd.f32 1e-05, %v190_v45  ;;  %506 = vmatmul.mubr.msk.f32.gmra.mrb[2].mxu0 %vm30_vm0, %v227_v61 }
 0x145   :  { %v199_v63 = vadd.f32 1e-05, %v183_v60  ;;  %v549_v2 = vpop.eup %548  ;;  %v175_v3 = vpop.xlane.xlu1 %174  ;;  %v235_v4 = vmul.f32 %v547_v54, %v710_v1 }
 0x146   :  { %558 = vrsqrt.f32 %v206_v62  ;;  %v191_v5 = vmul.f32 0.0625, %v175_v3  ;;  %v228_v55 = vmul.f32 %v549_v2, %v719_v10 }
 0x147   :  { %560 = vrsqrt.f32 %v199_v63  ;;  %518 = vmatmul.mubr.msk.f32.gmra.mrb[2].mxu1 %vm30_vm0, %v235_v4 }
 0x148   :  { %v551_v0 = vpop.eup %550  ;;  %v207_v6 = vadd.f32 1e-05, %v191_v5  ;;  %508 = vmatprep.mubr.msk.f32.mxu0 %vm30_vm0, %v228_v55 }
 0x149   :  { %v553_v7 = vpop.eup %552  ;;  %v236_v8 = vmul.f32 %v551_v0, %v722_v11 }
 0x14a   :  { %562 = vrsqrt.f32 %v207_v6  ;;  %v229_v9 = vmul.f32 %v553_v7, %v731_v23 }
 0x14b   :  { %520 = vmatprep.mubr.msk.f32.mxu1 %vm30_vm0, %v236_v8 }
 0x14c   :  { %v555_v1 = vpop.eup %554  ;;  %509 = vmatmul.mubr.msk.f32.gmra.mrb[4].mxu0 %vm30_vm0, %v229_v9 }
 0x14d   :  { %v557_v12 = vpop.eup %556  ;;  %v237_v10 = vmul.f32 %v555_v1, %v734_v17  ;;  %v463_v17 = vld [vmem:[%s875_s2] ss:$0 sm:$0xff] }
 0x14e   :  { %v230_v13 = vmul.f32 %v557_v12, %v743_v35 }
 0x14f   :  { %521 = vmatmul.mubr.msk.f32.gmra.mrb[4].mxu1 %vm30_vm0, %v237_v10 }
 0x150   :  { %v559_v14 = vpop.eup %558  ;;  %511 = vmatprep.mubr.msk.f32.mxu0 %vm30_vm0, %v230_v13 }
 0x151   :  { %v561_v15 = vpop.eup %560  ;;  %v238_v11 = vmul.f32 %v559_v14, %v746_v21 }
 0x152   :  { %v231_v23 = vmul.f32 %v561_v15, %v755_v47 }
 0x153   :  { %523 = vmatprep.mubr.msk.f32.mxu1 %vm30_vm0, %v238_v11 }
 0x154   :  { %v563_v18 = vpop.eup %562  ;;  %512 = vmatmul.mubr.msk.f32.gmra.mrb[6].mxu0 %vm30_vm0, %v231_v23 }
 0x155   :  { %v239_v19 = vmul.f32 %v563_v18, %v758_v25 }
 0x157   :  { %524 = vmatmul.mubr.msk.f32.gmra.mrb[6].mxu1 %vm30_vm0, %v239_v19 }
 0x20f   :  { %v504_v35 = vpop.f32.mrb[0].mxu0 }
 0x210   :  { %v369_v22 = vadd.f32 %v504_v35, %v463_v17  ;;  %v363_v16 = vpop.f32.mrb[1].mxu0 }
 0x211   :  { %v364_v21 = vadd.f32 %v463_v17, %v363_v16 }
 0x212   :  { %444 = vst.msk [vmem:[%s876_s3 + $0x8] sm:$0xff] %vm442_vm1, %v369_v22  ;;  %v516_v47 = vpop.f32.mrb[0].mxu1 }
 0x213   :  { %443 = vst.msk [vmem:[%s876_s3] sm:$0xff] %vm442_vm1, %v364_v21  ;;  %v409_v25 = vadd.f32 %v516_v47, %v463_v17  ;;  %v403_v26 = vpop.f32.mrb[1].mxu1 }
 0x214   :  { %v404_v27 = vadd.f32 %v463_v17, %v403_v26 }
 0x215   :  { %452 = vst.msk [vmem:[%s876_s3 + $0x48] sm:$0xff] %vm442_vm1, %v409_v25 }
 0x216   :  { %451 = vst.msk [vmem:[%s876_s3 + $0x40] sm:$0xff] %vm442_vm1, %v404_v27 }
 0x217   :  { %v507_v30 = vpop.f32.mrb[2].mxu0 }
 0x218   :  { %v379_v31 = vadd.f32 %v507_v30, %v463_v17  ;;  %v373_v32 = vpop.f32.mrb[3].mxu0 }
 0x219   :  { %v374_v33 = vadd.f32 %v463_v17, %v373_v32 }
 0x21a   :  { %446 = vst.msk [vmem:[%s876_s3 + $0x18] sm:$0xff] %vm442_vm1, %v379_v31  ;;  %v519_v34 = vpop.f32.mrb[2].mxu1 }
 0x21b   :  { %445 = vst.msk [vmem:[%s876_s3 + $0x10] sm:$0xff] %vm442_vm1, %v374_v33  ;;  %v419_v20 = vadd.f32 %v519_v34, %v463_v17  ;;  %v413_v38 = vpop.f32.mrb[3].mxu1 }
 0x21c   :  { %v414_v39 = vadd.f32 %v463_v17, %v413_v38 }
 0x21d   :  { %454 = vst.msk [vmem:[%s876_s3 + $0x58] sm:$0xff] %vm442_vm1, %v419_v20 }
 0x21e   :  { %453 = vst.msk [vmem:[%s876_s3 + $0x50] sm:$0xff] %vm442_vm1, %v414_v39 }
 0x21f   :  { %v510_v40 = vpop.f32.mrb[4].mxu0 }
 0x220   :  { %v389_v41 = vadd.f32 %v510_v40, %v463_v17  ;;  %v383_v42 = vpop.f32.mrb[5].mxu0 }
 0x221   :  { %v384_v43 = vadd.f32 %v463_v17, %v383_v42 }
 0x222   :  { %448 = vst.msk [vmem:[%s876_s3 + $0x28] sm:$0xff] %vm442_vm1, %v389_v41  ;;  %v522_v36 = vpop.f32.mrb[4].mxu1 }
 0x223   :  { %447 = vst.msk [vmem:[%s876_s3 + $0x20] sm:$0xff] %vm442_vm1, %v384_v43  ;;  %v429_v46 = vadd.f32 %v522_v36, %v463_v17  ;;  %v423_v24 = vpop.f32.mrb[5].mxu1 }
 0x224   :  { %v424_v48 = vadd.f32 %v463_v17, %v423_v24 }
 0x225   :  { %456 = vst.msk [vmem:[%s876_s3 + $0x68] sm:$0xff] %vm442_vm1, %v429_v46 }
 0x226   :  { %455 = vst.msk [vmem:[%s876_s3 + $0x60] sm:$0xff] %vm442_vm1, %v424_v48 }
 0x227   :  { %v513_v49 = vpop.f32.mrb[6].mxu0 }
 0x228   :  { %v399_v50 = vadd.f32 %v513_v49, %v463_v17  ;;  %v393_v51 = vpop.f32.mrb[7].mxu0 }
 0x229   :  { %v394_v44 = vadd.f32 %v463_v17, %v393_v51 }
 0x22a   :  { %450 = vst.msk [vmem:[%s876_s3 + $0x38] sm:$0xff] %vm442_vm1, %v399_v50  ;;  %v525_v52 = vpop.f32.mrb[6].mxu1 }
 0x22b   :  { %449 = vst.msk [vmem:[%s876_s3 + $0x30] sm:$0xff] %vm442_vm1, %v394_v44  ;;  %v439_v28 = vadd.f32 %v525_v52, %v463_v17  ;;  %v433_v37 = vpop.f32.mrb[7].mxu1 }
 0x22c   :  { %v434_v29 = vadd.f32 %v463_v17, %v433_v37 }
 0x22d   :  { %458 = vst.msk [vmem:[%s876_s3 + $0x78] sm:$0xff] %vm442_vm1, %v439_v28 }
 0x22e   :  { %457 = vst.msk [vmem:[%s876_s3 + $0x70] sm:$0xff] %vm442_vm1, %v434_v29 }

</bundles_post_ra>
